<compile_context>
chip_gen: v7x
topology: tpu7x:2x2x1
jax: 0.10.0
libtpu: 0.0.40
codegen_flags: <defaults>
</compile_context>

<pallas_src>
import functools
import math

import jax
import jax.numpy as jnp
from jax.experimental import pallas as pl
from jax.experimental.pallas import tpu as pltpu

# MXU operand dtype: bf16 gives ~3-4x MXU throughput vs multi-pass f32 on
# v5e/v6e/v7x.  Accumulation stays f32 everywhere.
MXU_DTYPE = jnp.bfloat16


def _pick_tile(dim: int, preferred: int) -> int:
    """`preferred` if it divides `dim`, else the full dim (always a legal block)."""
    return preferred if dim % preferred == 0 else dim


# ----------------------------------------------------------------------------
# LayerNorm (standalone — used for attn_ln, whose output is also the residual)
# ----------------------------------------------------------------------------
def _layernorm_kernel(x_ref, g_ref, b_ref, o_ref, *, eps):
    x = x_ref[...].astype(jnp.float32)                        # (TM, D)
    mean = jnp.mean(x, axis=-1, keepdims=True)
    xc = x - mean
    var = jnp.mean(xc * xc, axis=-1, keepdims=True)
    inv = jax.lax.rsqrt(var + eps)
    y = xc * inv * g_ref[...].astype(jnp.float32) + b_ref[...].astype(jnp.float32)
    o_ref[...] = y.astype(o_ref.dtype)


def layernorm(x, gamma, beta, *, eps=1e-5):
    M, D = x.shape
    tm = _pick_tile(M, 512)
    return pl.pallas_call(
        functools.partial(_layernorm_kernel, eps=eps),
        out_shape=jax.ShapeDtypeStruct((M, D), x.dtype),
        grid_spec=pltpu.PrefetchScalarGridSpec(
            num_scalar_prefetch=0,
            grid=(M // tm,),
            in_specs=[
                pl.BlockSpec((tm, D), lambda i: (i, 0)),
                pl.BlockSpec((1, D), lambda i: (0, 0)),    # gamma: resident
                pl.BlockSpec((1, D), lambda i: (0, 0)),    # beta:  resident
            ],
            out_specs=pl.BlockSpec((tm, D), lambda i: (i, 0)),
        ),
        compiler_params=pltpu.CompilerParams(dimension_semantics=("parallel",)),
    )(x, gamma.reshape(1, D), beta.reshape(1, D))


# ----------------------------------------------------------------------------
# Linear: tiled matmul (bf16 MXU operands, f32 accumulator) with optional
# fused LayerNorm prologue and fused bias / GELU / residual epilogue.
# ----------------------------------------------------------------------------
def _gelu_tanh(x):
    # TODO(synk): nn.GELU() defaults to the exact erf form; the tanh
    # approximation (max abs err ~3e-3) is used because it lowers cleanly on
    # all TPU generations.
    c = math.sqrt(2.0 / math.pi)
    return 0.5 * x * (1.0 + jnp.tanh(c * (x + 0.044715 * x * x * x)))


def _linear_kernel(x_ref, w_ref, b_ref, *rest, activation, has_residual,
                   has_ln, eps):
    pos = 0
    if has_ln:
        g_ref, bt_ref = rest[pos], rest[pos + 1]
        pos += 2
    if has_residual:
        r_ref = rest[pos]
        pos += 1
    o_ref, acc_ref = rest[pos], rest[pos + 1]

    @pl.when(pl.program_id(2) == 0)
    def _():
        acc_ref[...] = jnp.zeros_like(acc_ref)

    if has_ln:
        # Fused LayerNorm prologue.  The wrapper guarantees tk == K here
        # (single K step), so the full feature row is in this tile.
        xf = x_ref[...].astype(jnp.float32)
        mu = jnp.mean(xf, axis=-1, keepdims=True)
        xc = xf - mu
        var = jnp.mean(xc * xc, axis=-1, keepdims=True)
        xf = (xc * jax.lax.rsqrt(var + eps) * g_ref[...].astype(jnp.float32)
              + bt_ref[...].astype(jnp.float32))
        x_in = xf.astype(MXU_DTYPE)
    else:
        x_in = x_ref[...].astype(MXU_DTYPE)

    acc_ref[...] += jnp.dot(x_in, w_ref[...].astype(MXU_DTYPE),
                            preferred_element_type=jnp.float32)

    @pl.when(pl.program_id(2) == pl.num_programs(2) - 1)
    def _():
        out = acc_ref[...] + b_ref[...].astype(jnp.float32)
        if activation == "gelu":
            out = _gelu_tanh(out)
        if has_residual:
            out = out + r_ref[...].astype(jnp.float32)
        o_ref[...] = out.astype(o_ref.dtype)


def linear(x, w, b, *, activation=None, residual=None, ln=None, eps=1e-5):
    M, K = x.shape
    Kw, N = w.shape
    assert K == Kw
    tm = _pick_tile(M, 256)
    tn = _pick_tile(N, 512)
    tk = _pick_tile(K, 512)

    if ln is not None and tk != K:
        # LN fusion needs the full K row in one tile; fall back to standalone LN.
        x = layernorm(x, ln[0], ln[1], eps=eps)
        ln = None

    in_specs = [
        pl.BlockSpec((tm, tk), lambda i, j, k: (i, k)),
        pl.BlockSpec((tk, tn), lambda i, j, k: (k, j)),
        pl.BlockSpec((1, tn), lambda i, j, k: (0, j)),     # bias: resident per j
    ]
    args = [x, w, b.reshape(1, N)]
    if ln is not None:
        in_specs += [pl.BlockSpec((1, tk), lambda i, j, k: (0, k)),
                     pl.BlockSpec((1, tk), lambda i, j, k: (0, k))]
        args += [ln[0].reshape(1, K), ln[1].reshape(1, K)]
    if residual is not None:
        in_specs.append(pl.BlockSpec((tm, tn), lambda i, j, k: (i, j)))
        args.append(residual)

    return pl.pallas_call(
        functools.partial(_linear_kernel, activation=activation,
                          has_residual=residual is not None,
                          has_ln=ln is not None, eps=eps),
        out_shape=jax.ShapeDtypeStruct((M, N), x.dtype),
        grid_spec=pltpu.PrefetchScalarGridSpec(
            num_scalar_prefetch=0,
            grid=(M // tm, N // tn, K // tk),
            in_specs=in_specs,
            out_specs=pl.BlockSpec((tm, tn), lambda i, j, k: (i, j)),
            scratch_shapes=[pltpu.VMEM((tm, tn), jnp.float32)],
        ),
        compiler_params=pltpu.CompilerParams(
            dimension_semantics=("parallel", "parallel", "arbitrary")),
    )(*args)


# ----------------------------------------------------------------------------
# Causal multi-head attention, query-tiled, bf16 MXU operands.
# Also accumulates the head-averaged attention weights (module output).
# ----------------------------------------------------------------------------
def _attn_kernel(q_ref, k_ref, v_ref, pad_ref, ctx_ref, attn_ref, *,
                 scale, inv_heads):
    h = pl.program_id(2)
    tq = q_ref.shape[0]
    q_start = pl.program_id(1) * tq

    # Fold the 1/sqrt(Dh) scale into q in its native dtype, then hand the MXU
    # bf16 operands.  Scores / mask / softmax stay in f32.
    q = (q_ref[...] * scale).astype(MXU_DTYPE)                    # (tq, Dh)
    k = k_ref[...].astype(MXU_DTYPE)                              # (S,  Dh)

    s = jax.lax.dot_general(q, k, (((1,), (1,)), ((), ())),
                            preferred_element_type=jnp.float32)   # (tq, S)
    s = s + pad_ref[...].astype(jnp.float32)                      # key-padding bias (1, S)

    S = s.shape[1]
    row = jax.lax.broadcasted_iota(jnp.int32, (tq, S), 0) + q_start
    col = jax.lax.broadcasted_iota(jnp.int32, (tq, S), 1)
    s = jnp.where(col <= row, s, -1e30)                           # causal mask (f32)

    m = jnp.max(s, axis=-1, keepdims=True)
    e = jnp.exp(s - m)
    p = e * pl.reciprocal(jnp.sum(e, axis=-1, keepdims=True), approx=True)

    ctx = jnp.dot(p.astype(MXU_DTYPE), v_ref[...].astype(MXU_DTYPE),
                  preferred_element_type=jnp.float32)
    ctx_ref[...] = ctx.astype(ctx_ref.dtype)

    # Head-averaged attention weights: resident f32 output block, accumulated
    # across the innermost ("arbitrary") head axis.
    @pl.when(h == 0)
    def _():
        attn_ref[...] = jnp.zeros_like(attn_ref)

    attn_ref[...] += p * inv_heads


def attention(q, k, v, pad_bias, *, n_heads):
    B, H, S, Dh = q.shape
    tq = _pick_tile(S, 256)
    scale = 1.0 / math.sqrt(Dh)
    return pl.pallas_call(
        functools.partial(_attn_kernel, scale=scale, inv_heads=1.0 / n_heads),
        out_shape=(jax.ShapeDtypeStruct((B, H, S, Dh), q.dtype),
                   jax.ShapeDtypeStruct((B, S, S), jnp.float32)),
        grid_spec=pltpu.PrefetchScalarGridSpec(
            num_scalar_prefetch=0,
            grid=(B, S // tq, H),
            in_specs=[
                pl.BlockSpec((None, None, tq, Dh), lambda b, i, h: (b, h, i, 0)),
                pl.BlockSpec((None, None, S, Dh), lambda b, i, h: (b, h, 0, 0)),
                pl.BlockSpec((None, None, S, Dh), lambda b, i, h: (b, h, 0, 0)),
                pl.BlockSpec((None, 1, S), lambda b, i, h: (b, 0, 0)),
            ],
            out_specs=(
                pl.BlockSpec((None, None, tq, Dh), lambda b, i, h: (b, h, i, 0)),
                pl.BlockSpec((None, tq, S), lambda b, i, h: (b, i, 0)),
            ),
        ),
        compiler_params=pltpu.CompilerParams(
            dimension_semantics=("parallel", "parallel", "arbitrary")),
    )(q, k, v, pad_bias)


# ----------------------------------------------------------------------------
# Full layer
# ----------------------------------------------------------------------------
@functools.partial(jax.jit, static_argnames=("n_heads",))
def transformer_causal_layer(x, params, pad_bias, *, n_heads):
    B, S, D = x.shape
    Dh = D // n_heads

    x_flat = x.reshape(B * S, D)

    # --- attn_ln (standalone: its output is also the first residual) ---
    x_ln = layernorm(x_flat, params["ln1_g"], params["ln1_b"])

    # --- multi-head self-attention ---
    qkv = linear(x_ln, params["w_in"], params["b_in"])          # (B*S, 3D)
    qkv = qkv.reshape(B, S, 3, n_heads, Dh)
    # TODO(synk): these head-split transposes are XLA layout glue; removing
    # them needs a (1, Dh)-minor BlockSpec layout that is not portable across
    # TPU generations, so they are kept for robustness.
    q = jnp.transpose(qkv[:, :, 0], (0, 2, 1, 3))               # (B, H, S, Dh)
    k = jnp.transpose(qkv[:, :, 1], (0, 2, 1, 3))
    v = jnp.transpose(qkv[:, :, 2], (0, 2, 1, 3))

    ctx, attn_weights = attention(q, k, v, pad_bias, n_heads=n_heads)
    ctx = jnp.transpose(ctx, (0, 2, 1, 3)).reshape(B * S, D)

    # out-projection with the first residual fused (residual = attn_ln(x),
    # because the module overwrites x before the skip connection)
    x1 = linear(ctx, params["w_out"], params["b_out"], residual=x_ln)

    # --- feed-forward block: ff_ln fused into ff1, dropout p=0 -> no-op ---
    h1 = linear(x1, params["w_ff1"], params["b_ff1"], activation="gelu",
                ln=(params["ln2_g"], params["ln2_b"]))
    x2 = linear(h1, params["w_ff2"], params["b_ff2"], residual=x1)

    return x2.reshape(B, S, D), attn_weights


# ----------------------------------------------------------------------------
# Pure-JAX f32 reference mirroring the PyTorch forward (same tanh-GELU)
# ----------------------------------------------------------------------------
def _reference(x, params, pad_bias, n_heads):
    B, S, D = x.shape
    Dh = D // n_heads

    def ln(t, g, b):
        mu = jnp.mean(t, axis=-1, keepdims=True)
        var = jnp.mean((t - mu) ** 2, axis=-1, keepdims=True)
        return (t - mu) / jnp.sqrt(var + 1e-5) * g + b

    x = ln(x, params["ln1_g"], params["ln1_b"])
    qkv = x @ params["w_in"] + params["b_in"]
    q, k, v = jnp.split(qkv, 3, axis=-1)

    def heads(t):
        return t.reshape(B, S, n_heads, Dh).transpose(0, 2, 1, 3)

    q, k, v = heads(q), heads(k), heads(v)
    s = jnp.einsum("bhqd,bhkd->bhqk", q, k) / math.sqrt(Dh)
    s = s + pad_bias[:, None, :, :]
    row = jnp.arange(S)[:, None]
    col = jnp.arange(S)[None, :]
    s = jnp.where(col <= row, s, -1e30)
    p = jax.nn.softmax(s, axis=-1)
    ctx = jnp.einsum("bhqk,bhkd->bhqd", p, v)
    ctx = ctx.transpose(0, 2, 1, 3).reshape(B, S, D)
    attn_out = ctx @ params["w_out"] + params["b_out"]
    x = x + attn_out

    y = ln(x, params["ln2_g"], params["ln2_b"])
    h1 = jax.nn.gelu(y @ params["w_ff1"] + params["b_ff1"], approximate=True)
    x = x + h1 @ params["w_ff2"] + params["b_ff2"]
    return x, jnp.mean(p, axis=1)


if __name__ == "__main__":
    batch, seq, d_model, n_heads, d_ff = 2, 8, 32, 4, 64

    key = jax.random.PRNGKey(0)
    ks = jax.random.split(key, 13)
    s_in = 1.0 / math.sqrt(d_model)
    s_ff = 1.0 / math.sqrt(d_ff)
    params = {
        "ln1_g": 1.0 + 0.1 * jax.random.normal(ks[0], (d_model,), jnp.float32),
        "ln1_b": 0.1 * jax.random.normal(ks[1], (d_model,), jnp.float32),
        "w_in": s_in * jax.random.normal(ks[2], (d_model, 3 * d_model), jnp.float32),
        "b_in": 0.1 * jax.random.normal(ks[3], (3 * d_model,), jnp.float32),
        "w_out": s_in * jax.random.normal(ks[4], (d_model, d_model), jnp.float32),
        "b_out": 0.1 * jax.random.normal(ks[5], (d_model,), jnp.float32),
        "ln2_g": 1.0 + 0.1 * jax.random.normal(ks[6], (d_model,), jnp.float32),
        "ln2_b": 0.1 * jax.random.normal(ks[7], (d_model,), jnp.float32),
        "w_ff1": s_in * jax.random.normal(ks[8], (d_model, d_ff), jnp.float32),
        "b_ff1": 0.1 * jax.random.normal(ks[9], (d_ff,), jnp.float32),
        "w_ff2": s_ff * jax.random.normal(ks[10], (d_ff, d_model), jnp.float32),
        "b_ff2": 0.1 * jax.random.normal(ks[11], (d_model,), jnp.float32),
    }
    x = jax.random.normal(ks[12], (batch, seq, d_model), jnp.float32)

    # key_padding_mask is None in this demo -> zero additive bias.
    # (A boolean mask would map to jnp.where(mask, -1e30, 0.0).reshape(B,1,S).)
    pad_bias = jnp.zeros((batch, 1, seq), jnp.float32)

    out, attn_w = transformer_causal_layer(x, params, pad_bias, n_heads=n_heads)
    out = jax.block_until_ready(out)
    attn_w = jax.block_until_ready(attn_w)

    ref_out, ref_w = _reference(x, params, pad_bias, n_heads)

    assert out.shape == (batch, seq, d_model) and out.dtype == x.dtype
    assert attn_w.shape == (batch, seq, seq)
    # Tolerances account for bf16 MXU operands vs the pure-f32 reference.
    assert jnp.allclose(out, ref_out, atol=5e-2, rtol=5e-2), "output mismatch"
    assert jnp.allclose(attn_w, ref_w, atol=2e-2, rtol=5e-2), "attn weights mismatch"

    print("KERNEL_OK")
</pallas_src>

<mosaic_0001>
module attributes {stable_mosaic.version = 11 : i64} {
  func.func @_linear_kernel(%arg0: i32, %arg1: i32, %arg2: i32, %arg3: memref<16x32xf32, #tpu.memory_space<vmem>>, %arg4: memref<32x96xf32, #tpu.memory_space<vmem>>, %arg5: memref<1x96xf32, #tpu.memory_space<vmem>>, %arg6: memref<16x96xf32, #tpu.memory_space<vmem>>, %arg7: memref<16x96xf32, #tpu.memory_space<vmem>>) attributes {dimension_semantics = [#tpu.dimension_semantics<parallel>, #tpu.dimension_semantics<parallel>, #tpu.dimension_semantics<arbitrary>], iteration_bounds = array<i64: 1, 1, 1>, scalar_prefetch = 0 : i64, scratch_operands = 1 : i64, tpu.core_type = #tpu.core_type<tc>, window_params = [{transform_indices = @transform_0, window_bounds = array<i64: 16, 32>}, {transform_indices = @transform_1, window_bounds = array<i64: 32, 96>}, {transform_indices = @transform_2, window_bounds = array<i64: 1, 96>}, {transform_indices = @transform_3, window_bounds = array<i64: 16, 96>}]} {
    %c0_i32 = arith.constant 0 : i32
    %0 = arith.cmpi eq, %arg2, %c0_i32 : i32
    %1 = arith.extui %0 : i1 to i32
    %c0_i32_0 = arith.constant 0 : i32
    %2 = arith.cmpi ne, %1, %c0_i32_0 : i32
    scf.if %2 {
      %cst_10 = arith.constant 0.000000e+00 : f32
      %14 = vector.broadcast %cst_10 : f32 to vector<16x96xf32>
      %c0_11 = arith.constant 0 : index
      %c0_12 = arith.constant 0 : index
      %15 = vector.load %arg7[%c0_11, %c0_12] : memref<16x96xf32, #tpu.memory_space<vmem>>, vector<16x96xf32>
      tpu.vector_store %arg7[%c0_11, %c0_12], %14 {strides = array<i32>} : memref<16x96xf32, #tpu.memory_space<vmem>>, vector<16x96xf32>,
    } else {
    }
    %c0 = arith.constant 0 : index
    %c0_1 = arith.constant 0 : index
    %3 = vector.load %arg3[%c0, %c0_1] : memref<16x32xf32, #tpu.memory_space<vmem>>, vector<16x32xf32>
    %4 = arith.truncf %3 : vector<16x32xf32> to vector<16x32xbf16>
    %c0_2 = arith.constant 0 : index
    %c0_3 = arith.constant 0 : index
    %5 = vector.load %arg7[%c0_2, %c0_3] : memref<16x96xf32, #tpu.memory_space<vmem>>, vector<16x96xf32>
    %c0_4 = arith.constant 0 : index
    %c0_5 = arith.constant 0 : index
    %6 = vector.load %arg4[%c0_4, %c0_5] : memref<32x96xf32, #tpu.memory_space<vmem>>, vector<32x96xf32>
    %7 = arith.truncf %6 : vector<32x96xf32> to vector<32x96xbf16>
    %cst = arith.constant dense<0.000000e+00> : vector<16x96xf32>
    %8 = tpu.matmul %4, %7, %cst {dimension_numbers = #tpu.dot_dimension_numbers<[1], [0], [0], [1], [0, 0, 1, 1], [], []>} : vector<16x32xbf16>, vector<32x96xbf16>, vector<16x96xf32> -> vector<16x96xf32>
    %9 = arith.addf %5, %8 : vector<16x96xf32>
    %c0_6 = arith.constant 0 : index
    %c0_7 = arith.constant 0 : index
    %10 = vector.load %arg7[%c0_6, %c0_7] : memref<16x96xf32, #tpu.memory_space<vmem>>, vector<16x96xf32>
    tpu.vector_store %arg7[%c0_6, %c0_7], %9 {strides = array<i32>} : memref<16x96xf32, #tpu.memory_space<vmem>>, vector<16x96xf32>,
    %c0_i32_8 = arith.constant 0 : i32
    %11 = arith.cmpi eq, %arg2, %c0_i32_8 : i32
    %12 = arith.extui %11 : i1 to i32
    %c0_i32_9 = arith.constant 0 : i32
    %13 = arith.cmpi ne, %12, %c0_i32_9 : i32
    scf.if %13 {
      %c0_10 = arith.constant 0 : index
      %c0_11 = arith.constant 0 : index
      %14 = vector.load %arg7[%c0_10, %c0_11] : memref<16x96xf32, #tpu.memory_space<vmem>>, vector<16x96xf32>
      %c0_12 = arith.constant 0 : index
      %c0_13 = arith.constant 0 : index
      %15 = vector.load %arg5[%c0_12, %c0_13] : memref<1x96xf32, #tpu.memory_space<vmem>>, vector<1x96xf32>
      %16 = vector.broadcast %15 : vector<1x96xf32> to vector<16x96xf32>
      %17 = arith.addf %14, %16 : vector<16x96xf32>
      %c0_14 = arith.constant 0 : index
      %c0_15 = arith.constant 0 : index
      %18 = vector.load %arg6[%c0_14, %c0_15] : memref<16x96xf32, #tpu.memory_space<vmem>>, vector<16x96xf32>
      tpu.vector_store %arg6[%c0_14, %c0_15], %17 {strides = array<i32>} : memref<16x96xf32, #tpu.memory_space<vmem>>, vector<16x96xf32>,
    } else {
    }
    return
  }
  func.func @transform_0(%arg0: i32, %arg1: i32, %arg2: i32) -> (i32, i32) {
    %c0_i32 = arith.constant 0 : i32
    return %arg0, %arg2 : i32, i32
  }
  func.func @transform_1(%arg0: i32, %arg1: i32, %arg2: i32) -> (i32, i32) {
    %c0_i32 = arith.constant 0 : i32
    return %arg2, %arg1 : i32, i32
  }
  func.func @transform_2(%arg0: i32, %arg1: i32, %arg2: i32) -> (i32, i32) {
    %c0_i32 = arith.constant 0 : i32
    %c0_i32_0 = arith.constant 0 : i32
    return %c0_i32, %arg1 : i32, i32
  }
  func.func @transform_3(%arg0: i32, %arg1: i32, %arg2: i32) -> (i32, i32) {
    %c0_i32 = arith.constant 0 : i32
    return %arg0, %arg1 : i32, i32
  }
}

module attributes {stable_mosaic.version = 11 : i64} {
  func.func @_layernorm_kernel(%arg0: i32, %arg1: memref<16x32xf32, #tpu.memory_space<vmem>>, %arg2: memref<1x32xf32, #tpu.memory_space<vmem>>, %arg3: memref<1x32xf32, #tpu.memory_space<vmem>>, %arg4: memref<16x32xf32, #tpu.memory_space<vmem>>) attributes {dimension_semantics = [#tpu.dimension_semantics<parallel>], iteration_bounds = array<i64: 1>, scalar_prefetch = 0 : i64, scratch_operands = 0 : i64, tpu.core_type = #tpu.core_type<tc>, window_params = [{transform_indices = @transform_0, window_bounds = array<i64: 16, 32>}, {pipeline_mode = #tpu.pipeline_mode<synchronous>, transform_indices = @transform_1, window_bounds = array<i64: 1, 32>}, {pipeline_mode = #tpu.pipeline_mode<synchronous>, transform_indices = @transform_2, window_bounds = array<i64: 1, 32>}, {transform_indices = @transform_3, window_bounds = array<i64: 16, 32>}]} {
    %c0 = arith.constant 0 : index
    %c0_0 = arith.constant 0 : index
    %0 = vector.load %arg1[%c0, %c0_0] : memref<16x32xf32, #tpu.memory_space<vmem>>, vector<16x32xf32>
    %cst = arith.constant dense<0.000000e+00> : vector<16xf32>
    %1 = vector.multi_reduction <add>, %0, %cst [1] : vector<16x32xf32> to vector<16xf32>
    %2 = vector.shape_cast %1 : vector<16xf32> to vector<16x1xf32>
    %cst_1 = arith.constant 3.200000e+01 : f32
    %3 = vector.broadcast %cst_1 : f32 to vector<16x1xf32>
    %4 = arith.divf %2, %3 : vector<16x1xf32>
    %5 = vector.broadcast %4 : vector<16x1xf32> to vector<16x32xf32>
    %6 = arith.subf %0, %5 : vector<16x32xf32>
    %7 = arith.mulf %6, %6 : vector<16x32xf32>
    %cst_2 = arith.constant dense<0.000000e+00> : vector<16xf32>
    %8 = vector.multi_reduction <add>, %7, %cst_2 [1] : vector<16x32xf32> to vector<16xf32>
    %9 = vector.shape_cast %8 : vector<16xf32> to vector<16x1xf32>
    %cst_3 = arith.constant 3.200000e+01 : f32
    %10 = vector.broadcast %cst_3 : f32 to vector<16x1xf32>
    %11 = arith.divf %9, %10 : vector<16x1xf32>
    %cst_4 = arith.constant 9.99999974E-6 : f32
    %12 = vector.broadcast %cst_4 : f32 to vector<16x1xf32>
    %13 = arith.addf %11, %12 : vector<16x1xf32>
    %14 = math.rsqrt %13 : vector<16x1xf32>
    %15 = vector.broadcast %14 : vector<16x1xf32> to vector<16x32xf32>
    %16 = arith.mulf %6, %15 : vector<16x32xf32>
    %c0_5 = arith.constant 0 : index
    %c0_6 = arith.constant 0 : index
    %17 = vector.load %arg2[%c0_5, %c0_6] : memref<1x32xf32, #tpu.memory_space<vmem>>, vector<1x32xf32>
    %18 = vector.broadcast %17 : vector<1x32xf32> to vector<16x32xf32>
    %19 = arith.mulf %16, %18 : vector<16x32xf32>
    %c0_7 = arith.constant 0 : index
    %c0_8 = arith.constant 0 : index
    %20 = vector.load %arg3[%c0_7, %c0_8] : memref<1x32xf32, #tpu.memory_space<vmem>>, vector<1x32xf32>
    %21 = vector.broadcast %20 : vector<1x32xf32> to vector<16x32xf32>
    %22 = arith.addf %19, %21 : vector<16x32xf32>
    %c0_9 = arith.constant 0 : index
    %c0_10 = arith.constant 0 : index
    %23 = vector.load %arg4[%c0_9, %c0_10] : memref<16x32xf32, #tpu.memory_space<vmem>>, vector<16x32xf32>
    tpu.vector_store %arg4[%c0_9, %c0_10], %22 {strides = array<i32>} : memref<16x32xf32, #tpu.memory_space<vmem>>, vector<16x32xf32>,
    return
  }
  func.func @transform_0(%arg0: i32) -> (i32, i32) {
    %c0_i32 = arith.constant 0 : i32
    %c0_i32_0 = arith.constant 0 : i32
    return %arg0, %c0_i32 : i32, i32
  }
  func.func @transform_1(%arg0: i32) -> (i32, i32) {
    %c0_i32 = arith.constant 0 : i32
    %c0_i32_0 = arith.constant 0 : i32
    %c0_i32_1 = arith.constant 0 : i32
    return %c0_i32, %c0_i32_0 : i32, i32
  }
  func.func @transform_2(%arg0: i32) -> (i32, i32) {
    %c0_i32 = arith.constant 0 : i32
    %c0_i32_0 = arith.constant 0 : i32
    %c0_i32_1 = arith.constant 0 : i32
    return %c0_i32, %c0_i32_0 : i32, i32
  }
  func.func @transform_3(%arg0: i32) -> (i32, i32) {
    %c0_i32 = arith.constant 0 : i32
    %c0_i32_0 = arith.constant 0 : i32
    return %arg0, %c0_i32 : i32, i32
  }
}

module attributes {stable_mosaic.version = 11 : i64} {
  func.func @_attn_kernel(%arg0: i32, %arg1: i32, %arg2: i32, %arg3: memref<1x1x8x8xf32, #tpu.memory_space<vmem>>, %arg4: memref<1x1x8x8xf32, #tpu.memory_space<vmem>>, %arg5: memref<1x1x8x8xf32, #tpu.memory_space<vmem>>, %arg6: memref<1x1x8xf32, #tpu.memory_space<vmem>>, %arg7: memref<1x1x8x8xf32, #tpu.memory_space<vmem>>, %arg8: memref<1x8x8xf32, #tpu.memory_space<vmem>>) attributes {dimension_semantics = [#tpu.dimension_semantics<parallel>, #tpu.dimension_semantics<parallel>, #tpu.dimension_semantics<arbitrary>], iteration_bounds = array<i64: 2, 1, 4>, scalar_prefetch = 0 : i64, scratch_operands = 0 : i64, tpu.core_type = #tpu.core_type<tc>, window_params = [{transform_indices = @transform_0, window_bounds = array<i64: 1, 1, 8, 8>}, {transform_indices = @transform_1, window_bounds = array<i64: 1, 1, 8, 8>}, {transform_indices = @transform_2, window_bounds = array<i64: 1, 1, 8, 8>}, {transform_indices = @transform_3, window_bounds = array<i64: 1, 1, 8>}, {transform_indices = @transform_4, window_bounds = array<i64: 1, 1, 8, 8>}, {transform_indices = @transform_5, window_bounds = array<i64: 1, 8, 8>}]} {
    %c8_i32 = arith.constant 8 : i32
    %0 = arith.muli %arg1, %c8_i32 : i32
    %c0 = arith.constant 0 : index
    %c0_0 = arith.constant 0 : index
    %c0_1 = arith.constant 0 : index
    %c0_2 = arith.constant 0 : index
    %1 = vector.load %arg3[%c0, %c0_0, %c0_1, %c0_2] : memref<1x1x8x8xf32, #tpu.memory_space<vmem>>, vector<1x1x8x8xf32>
    %2 = vector.shape_cast %1 : vector<1x1x8x8xf32> to vector<8x8xf32>
    %cst = arith.constant 0.353553385 : f32
    %3 = vector.broadcast %cst : f32 to vector<8x8xf32>
    %4 = arith.mulf %2, %3 : vector<8x8xf32>
    %5 = arith.truncf %4 : vector<8x8xf32> to vector<8x8xbf16>
    %c0_3 = arith.constant 0 : index
    %c0_4 = arith.constant 0 : index
    %c0_5 = arith.constant 0 : index
    %c0_6 = arith.constant 0 : index
    %6 = vector.load %arg4[%c0_3, %c0_4, %c0_5, %c0_6] : memref<1x1x8x8xf32, #tpu.memory_space<vmem>>, vector<1x1x8x8xf32>
    %7 = vector.shape_cast %6 : vector<1x1x8x8xf32> to vector<8x8xf32>
    %8 = arith.truncf %7 : vector<8x8xf32> to vector<8x8xbf16>
    %cst_7 = arith.constant dense<0.000000e+00> : vector<8x8xf32>
    %9 = tpu.matmul %5, %8, %cst_7 {dimension_numbers = #tpu.dot_dimension_numbers<[1], [1], [0], [0], [0, 0, 1, 0], [], []>} : vector<8x8xbf16>, vector<8x8xbf16>, vector<8x8xf32> -> vector<8x8xf32>
    %c0_8 = arith.constant 0 : index
    %c0_9 = arith.constant 0 : index
    %c0_10 = arith.constant 0 : index
    %10 = vector.load %arg6[%c0_8, %c0_9, %c0_10] : memref<1x1x8xf32, #tpu.memory_space<vmem>>, vector<1x1x8xf32>
    %11 = vector.shape_cast %10 : vector<1x1x8xf32> to vector<1x8xf32>
    %12 = vector.broadcast %11 : vector<1x8xf32> to vector<8x8xf32>
    %13 = arith.addf %9, %12 : vector<8x8xf32>
    %14 = tpu.iota {dimensions = array<i32: 0>} : vector<8x8xi32>
    %15 = vector.broadcast %0 : i32 to vector<8x8xi32>
    %16 = arith.addi %14, %15 : vector<8x8xi32>
    %17 = tpu.iota {dimensions = array<i32: 1>} : vector<8x8xi32>
    %18 = arith.cmpi sle, %17, %16 : vector<8x8xi32>
    %cst_11 = arith.constant -1.000000e+30 : f32
    %19 = vector.broadcast %cst_11 : f32 to vector<8x8xf32>
    %20 = arith.select %18, %13, %19 : vector<8x8xi1>, vector<8x8xf32>
    %cst_12 = arith.constant dense<0xFF800000> : vector<8xf32>
    %21 = vector.multi_reduction <maximumf>, %20, %cst_12 [1] : vector<8x8xf32> to vector<8xf32>
    %22 = vector.shape_cast %21 : vector<8xf32> to vector<8x1xf32>
    %23 = vector.broadcast %22 : vector<8x1xf32> to vector<8x8xf32>
    %24 = arith.subf %20, %23 : vector<8x8xf32>
    %25 = math.exp %24 : vector<8x8xf32>
    %cst_13 = arith.constant dense<0.000000e+00> : vector<8xf32>
    %26 = vector.multi_reduction <add>, %25, %cst_13 [1] : vector<8x8xf32> to vector<8xf32>
    %27 = vector.shape_cast %26 : vector<8xf32> to vector<8x1xf32>
    %28 = tpu.reciprocal %27 {approx = true} : vector<8x1xf32> -> vector<8x1xf32>
    %29 = vector.broadcast %28 : vector<8x1xf32> to vector<8x8xf32>
    %30 = arith.mulf %25, %29 : vector<8x8xf32>
    %31 = arith.truncf %30 : vector<8x8xf32> to vector<8x8xbf16>
    %c0_14 = arith.constant 0 : index
    %c0_15 = arith.constant 0 : index
    %c0_16 = arith.constant 0 : index
    %c0_17 = arith.constant 0 : index
    %32 = vector.load %arg5[%c0_14, %c0_15, %c0_16, %c0_17] : memref<1x1x8x8xf32, #tpu.memory_space<vmem>>, vector<1x1x8x8xf32>
    %33 = vector.shape_cast %32 : vector<1x1x8x8xf32> to vector<8x8xf32>
    %34 = arith.truncf %33 : vector<8x8xf32> to vector<8x8xbf16>
    %cst_18 = arith.constant dense<0.000000e+00> : vector<8x8xf32>
    %35 = tpu.matmul %31, %34, %cst_18 {dimension_numbers = #tpu.dot_dimension_numbers<[1], [0], [0], [1], [0, 0, 1, 1], [], []>} : vector<8x8xbf16>, vector<8x8xbf16>, vector<8x8xf32> -> vector<8x8xf32>
    %c0_19 = arith.constant 0 : index
    %c0_20 = arith.constant 0 : index
    %c0_21 = arith.constant 0 : index
    %c0_22 = arith.constant 0 : index
    %36 = vector.load %arg7[%c0_19, %c0_20, %c0_21, %c0_22] : memref<1x1x8x8xf32, #tpu.memory_space<vmem>>, vector<1x1x8x8xf32>
    %37 = vector.shape_cast %36 : vector<1x1x8x8xf32> to vector<8x8xf32>
    %38 = vector.shape_cast %35 : vector<8x8xf32> to vector<1x1x8x8xf32>
    tpu.vector_store %arg7[%c0_19, %c0_20, %c0_21, %c0_22], %38 {strides = array<i32>} : memref<1x1x8x8xf32, #tpu.memory_space<vmem>>, vector<1x1x8x8xf32>,
    %c0_i32 = arith.constant 0 : i32
    %39 = arith.cmpi eq, %arg2, %c0_i32 : i32
    %40 = arith.extui %39 : i1 to i32
    %c0_i32_23 = arith.constant 0 : i32
    %41 = arith.cmpi ne, %40, %c0_i32_23 : i32
    scf.if %41 {
      %cst_31 = arith.constant 0.000000e+00 : f32
      %50 = vector.broadcast %cst_31 : f32 to vector<8x8xf32>
      %c0_32 = arith.constant 0 : index
      %c0_33 = arith.constant 0 : index
      %c0_34 = arith.constant 0 : index
      %51 = vector.load %arg8[%c0_32, %c0_33, %c0_34] : memref<1x8x8xf32, #tpu.memory_space<vmem>>, vector<1x8x8xf32>
      %52 = vector.shape_cast %51 : vector<1x8x8xf32> to vector<8x8xf32>
      %53 = vector.shape_cast %50 : vector<8x8xf32> to vector<1x8x8xf32>
      tpu.vector_store %arg8[%c0_32, %c0_33, %c0_34], %53 {strides = array<i32>} : memref<1x8x8xf32, #tpu.memory_space<vmem>>, vector<1x8x8xf32>,
    } else {
    }
    %c0_24 = arith.constant 0 : index
    %c0_25 = arith.constant 0 : index
    %c0_26 = arith.constant 0 : index
    %42 = vector.load %arg8[%c0_24, %c0_25, %c0_26] : memref<1x8x8xf32, #tpu.memory_space<vmem>>, vector<1x8x8xf32>
    %43 = vector.shape_cast %42 : vector<1x8x8xf32> to vector<8x8xf32>
    %cst_27 = arith.constant 2.500000e-01 : f32
    %44 = vector.broadcast %cst_27 : f32 to vector<8x8xf32>
    %45 = arith.mulf %30, %44 : vector<8x8xf32>
    %46 = arith.addf %43, %45 : vector<8x8xf32>
    %c0_28 = arith.constant 0 : index
    %c0_29 = arith.constant 0 : index
    %c0_30 = arith.constant 0 : index
    %47 = vector.load %arg8[%c0_28, %c0_29, %c0_30] : memref<1x8x8xf32, #tpu.memory_space<vmem>>, vector<1x8x8xf32>
    %48 = vector.shape_cast %47 : vector<1x8x8xf32> to vector<8x8xf32>
    %49 = vector.shape_cast %46 : vector<8x8xf32> to vector<1x8x8xf32>
    tpu.vector_store %arg8[%c0_28, %c0_29, %c0_30], %49 {strides = array<i32>} : memref<1x8x8xf32, #tpu.memory_space<vmem>>, vector<1x8x8xf32>,
    return
  }
  func.func @transform_0(%arg0: i32, %arg1: i32, %arg2: i32) -> (i32, i32, i32, i32) {
    %c0_i32 = arith.constant 0 : i32
    %c0_i32_0 = arith.constant 0 : i32
    return %arg0, %arg2, %arg1, %c0_i32 : i32, i32, i32, i32
  }
  func.func @transform_1(%arg0: i32, %arg1: i32, %arg2: i32) -> (i32, i32, i32, i32) {
    %c0_i32 = arith.constant 0 : i32
    %c0_i32_0 = arith.constant 0 : i32
    %c0_i32_1 = arith.constant 0 : i32
    return %arg0, %arg2, %c0_i32, %c0_i32_0 : i32, i32, i32, i32
  }
  func.func @transform_2(%arg0: i32, %arg1: i32, %arg2: i32) -> (i32, i32, i32, i32) {
    %c0_i32 = arith.constant 0 : i32
    %c0_i32_0 = arith.constant 0 : i32
    %c0_i32_1 = arith.constant 0 : i32
    return %arg0, %arg2, %c0_i32, %c0_i32_0 : i32, i32, i32, i32
  }
  func.func @transform_3(%arg0: i32, %arg1: i32, %arg2: i32) -> (i32, i32, i32) {
    %c0_i32 = arith.constant 0 : i32
    %c0_i32_0 = arith.constant 0 : i32
    %c0_i32_1 = arith.constant 0 : i32
    return %arg0, %c0_i32, %c0_i32_0 : i32, i32, i32
  }
  func.func @transform_4(%arg0: i32, %arg1: i32, %arg2: i32) -> (i32, i32, i32, i32) {
    %c0_i32 = arith.constant 0 : i32
    %c0_i32_0 = arith.constant 0 : i32
    return %arg0, %arg2, %arg1, %c0_i32 : i32, i32, i32, i32
  }
  func.func @transform_5(%arg0: i32, %arg1: i32, %arg2: i32) -> (i32, i32, i32) {
    %c0_i32 = arith.constant 0 : i32
    %c0_i32_0 = arith.constant 0 : i32
    return %arg0, %arg1, %c0_i32 : i32, i32, i32
  }
}

module attributes {stable_mosaic.version = 11 : i64} {
  func.func @_linear_kernel(%arg0: i32, %arg1: i32, %arg2: i32, %arg3: memref<16x32xf32, #tpu.memory_space<vmem>>, %arg4: memref<32x32xf32, #tpu.memory_space<vmem>>, %arg5: memref<1x32xf32, #tpu.memory_space<vmem>>, %arg6: memref<16x32xf32, #tpu.memory_space<vmem>>, %arg7: memref<16x32xf32, #tpu.memory_space<vmem>>, %arg8: memref<16x32xf32, #tpu.memory_space<vmem>>) attributes {dimension_semantics = [#tpu.dimension_semantics<parallel>, #tpu.dimension_semantics<parallel>, #tpu.dimension_semantics<arbitrary>], iteration_bounds = array<i64: 1, 1, 1>, scalar_prefetch = 0 : i64, scratch_operands = 1 : i64, tpu.core_type = #tpu.core_type<tc>, window_params = [{transform_indices = @transform_0, window_bounds = array<i64: 16, 32>}, {transform_indices = @transform_1, window_bounds = array<i64: 32, 32>}, {transform_indices = @transform_2, window_bounds = array<i64: 1, 32>}, {transform_indices = @transform_3, window_bounds = array<i64: 16, 32>}, {transform_indices = @transform_4, window_bounds = array<i64: 16, 32>}]} {
    %c0_i32 = arith.constant 0 : i32
    %0 = arith.cmpi eq, %arg2, %c0_i32 : i32
    %1 = arith.extui %0 : i1 to i32
    %c0_i32_0 = arith.constant 0 : i32
    %2 = arith.cmpi ne, %1, %c0_i32_0 : i32
    scf.if %2 {
      %cst_10 = arith.constant 0.000000e+00 : f32
      %14 = vector.broadcast %cst_10 : f32 to vector<16x32xf32>
      %c0_11 = arith.constant 0 : index
      %c0_12 = arith.constant 0 : index
      %15 = vector.load %arg8[%c0_11, %c0_12] : memref<16x32xf32, #tpu.memory_space<vmem>>, vector<16x32xf32>
      tpu.vector_store %arg8[%c0_11, %c0_12], %14 {strides = array<i32>} : memref<16x32xf32, #tpu.memory_space<vmem>>, vector<16x32xf32>,
    } else {
    }
    %c0 = arith.constant 0 : index
    %c0_1 = arith.constant 0 : index
    %3 = vector.load %arg3[%c0, %c0_1] : memref<16x32xf32, #tpu.memory_space<vmem>>, vector<16x32xf32>
    %4 = arith.truncf %3 : vector<16x32xf32> to vector<16x32xbf16>
    %c0_2 = arith.constant 0 : index
    %c0_3 = arith.constant 0 : index
    %5 = vector.load %arg8[%c0_2, %c0_3] : memref<16x32xf32, #tpu.memory_space<vmem>>, vector<16x32xf32>
    %c0_4 = arith.constant 0 : index
    %c0_5 = arith.constant 0 : index
    %6 = vector.load %arg4[%c0_4, %c0_5] : memref<32x32xf32, #tpu.memory_space<vmem>>, vector<32x32xf32>
    %7 = arith.truncf %6 : vector<32x32xf32> to vector<32x32xbf16>
    %cst = arith.constant dense<0.000000e+00> : vector<16x32xf32>
    %8 = tpu.matmul %4, %7, %cst {dimension_numbers = #tpu.dot_dimension_numbers<[1], [0], [0], [1], [0, 0, 1, 1], [], []>} : vector<16x32xbf16>, vector<32x32xbf16>, vector<16x32xf32> -> vector<16x32xf32>
    %9 = arith.addf %5, %8 : vector<16x32xf32>
    %c0_6 = arith.constant 0 : index
    %c0_7 = arith.constant 0 : index
    %10 = vector.load %arg8[%c0_6, %c0_7] : memref<16x32xf32, #tpu.memory_space<vmem>>, vector<16x32xf32>
    tpu.vector_store %arg8[%c0_6, %c0_7], %9 {strides = array<i32>} : memref<16x32xf32, #tpu.memory_space<vmem>>, vector<16x32xf32>,
    %c0_i32_8 = arith.constant 0 : i32
    %11 = arith.cmpi eq, %arg2, %c0_i32_8 : i32
    %12 = arith.extui %11 : i1 to i32
    %c0_i32_9 = arith.constant 0 : i32
    %13 = arith.cmpi ne, %12, %c0_i32_9 : i32
    scf.if %13 {
      %c0_10 = arith.constant 0 : index
      %c0_11 = arith.constant 0 : index
      %14 = vector.load %arg8[%c0_10, %c0_11] : memref<16x32xf32, #tpu.memory_space<vmem>>, vector<16x32xf32>
      %c0_12 = arith.constant 0 : index
      %c0_13 = arith.constant 0 : index
      %15 = vector.load %arg5[%c0_12, %c0_13] : memref<1x32xf32, #tpu.memory_space<vmem>>, vector<1x32xf32>
      %16 = vector.broadcast %15 : vector<1x32xf32> to vector<16x32xf32>
      %17 = arith.addf %14, %16 : vector<16x32xf32>
      %c0_14 = arith.constant 0 : index
      %c0_15 = arith.constant 0 : index
      %18 = vector.load %arg6[%c0_14, %c0_15] : memref<16x32xf32, #tpu.memory_space<vmem>>, vector<16x32xf32>
      %19 = arith.addf %17, %18 : vector<16x32xf32>
      %c0_16 = arith.constant 0 : index
      %c0_17 = arith.constant 0 : index
      %20 = vector.load %arg7[%c0_16, %c0_17] : memref<16x32xf32, #tpu.memory_space<vmem>>, vector<16x32xf32>
      tpu.vector_store %arg7[%c0_16, %c0_17], %19 {strides = array<i32>} : memref<16x32xf32, #tpu.memory_space<vmem>>, vector<16x32xf32>,
    } else {
    }
    return
  }
  func.func @transform_0(%arg0: i32, %arg1: i32, %arg2: i32) -> (i32, i32) {
    %c0_i32 = arith.constant 0 : i32
    return %arg0, %arg2 : i32, i32
  }
  func.func @transform_1(%arg0: i32, %arg1: i32, %arg2: i32) -> (i32, i32) {
    %c0_i32 = arith.constant 0 : i32
    return %arg2, %arg1 : i32, i32
  }
  func.func @transform_2(%arg0: i32, %arg1: i32, %arg2: i32) -> (i32, i32) {
    %c0_i32 = arith.constant 0 : i32
    %c0_i32_0 = arith.constant 0 : i32
    return %c0_i32, %arg1 : i32, i32
  }
  func.func @transform_3(%arg0: i32, %arg1: i32, %arg2: i32) -> (i32, i32) {
    %c0_i32 = arith.constant 0 : i32
    return %arg0, %arg1 : i32, i32
  }
  func.func @transform_4(%arg0: i32, %arg1: i32, %arg2: i32) -> (i32, i32) {
    %c0_i32 = arith.constant 0 : i32
    return %arg0, %arg1 : i32, i32
  }
}

module attributes {stable_mosaic.version = 11 : i64} {
  func.func @_linear_kernel(%arg0: i32, %arg1: i32, %arg2: i32, %arg3: memref<16x32xf32, #tpu.memory_space<vmem>>, %arg4: memref<32x64xf32, #tpu.memory_space<vmem>>, %arg5: memref<1x64xf32, #tpu.memory_space<vmem>>, %arg6: memref<1x32xf32, #tpu.memory_space<vmem>>, %arg7: memref<1x32xf32, #tpu.memory_space<vmem>>, %arg8: memref<16x64xf32, #tpu.memory_space<vmem>>, %arg9: memref<16x64xf32, #tpu.memory_space<vmem>>) attributes {dimension_semantics = [#tpu.dimension_semantics<parallel>, #tpu.dimension_semantics<parallel>, #tpu.dimension_semantics<arbitrary>], iteration_bounds = array<i64: 1, 1, 1>, scalar_prefetch = 0 : i64, scratch_operands = 1 : i64, tpu.core_type = #tpu.core_type<tc>, window_params = [{transform_indices = @transform_0, window_bounds = array<i64: 16, 32>}, {transform_indices = @transform_1, window_bounds = array<i64: 32, 64>}, {transform_indices = @transform_2, window_bounds = array<i64: 1, 64>}, {transform_indices = @transform_3, window_bounds = array<i64: 1, 32>}, {transform_indices = @transform_4, window_bounds = array<i64: 1, 32>}, {transform_indices = @transform_5, window_bounds = array<i64: 16, 64>}]} {
    %c0_i32 = arith.constant 0 : i32
    %0 = arith.cmpi eq, %arg2, %c0_i32 : i32
    %1 = arith.extui %0 : i1 to i32
    %c0_i32_0 = arith.constant 0 : i32
    %2 = arith.cmpi ne, %1, %c0_i32_0 : i32
    scf.if %2 {
      %cst_19 = arith.constant 0.000000e+00 : f32
      %36 = vector.broadcast %cst_19 : f32 to vector<16x64xf32>
      %c0_20 = arith.constant 0 : index
      %c0_21 = arith.constant 0 : index
      %37 = vector.load %arg9[%c0_20, %c0_21] : memref<16x64xf32, #tpu.memory_space<vmem>>, vector<16x64xf32>
      tpu.vector_store %arg9[%c0_20, %c0_21], %36 {strides = array<i32>} : memref<16x64xf32, #tpu.memory_space<vmem>>, vector<16x64xf32>,
    } else {
    }
    %c0 = arith.constant 0 : index
    %c0_1 = arith.constant 0 : index
    %3 = vector.load %arg3[%c0, %c0_1] : memref<16x32xf32, #tpu.memory_space<vmem>>, vector<16x32xf32>
    %cst = arith.constant dense<0.000000e+00> : vector<16xf32>
    %4 = vector.multi_reduction <add>, %3, %cst [1] : vector<16x32xf32> to vector<16xf32>
    %5 = vector.shape_cast %4 : vector<16xf32> to vector<16x1xf32>
    %cst_2 = arith.constant 3.200000e+01 : f32
    %6 = vector.broadcast %cst_2 : f32 to vector<16x1xf32>
    %7 = arith.divf %5, %6 : vector<16x1xf32>
    %8 = vector.broadcast %7 : vector<16x1xf32> to vector<16x32xf32>
    %9 = arith.subf %3, %8 : vector<16x32xf32>
    %10 = arith.mulf %9, %9 : vector<16x32xf32>
    %cst_3 = arith.constant dense<0.000000e+00> : vector<16xf32>
    %11 = vector.multi_reduction <add>, %10, %cst_3 [1] : vector<16x32xf32> to vector<16xf32>
    %12 = vector.shape_cast %11 : vector<16xf32> to vector<16x1xf32>
    %cst_4 = arith.constant 3.200000e+01 : f32
    %13 = vector.broadcast %cst_4 : f32 to vector<16x1xf32>
    %14 = arith.divf %12, %13 : vector<16x1xf32>
    %cst_5 = arith.constant 9.99999974E-6 : f32
    %15 = vector.broadcast %cst_5 : f32 to vector<16x1xf32>
    %16 = arith.addf %14, %15 : vector<16x1xf32>
    %17 = math.rsqrt %16 : vector<16x1xf32>
    %18 = vector.broadcast %17 : vector<16x1xf32> to vector<16x32xf32>
    %19 = arith.mulf %9, %18 : vector<16x32xf32>
    %c0_6 = arith.constant 0 : index
    %c0_7 = arith.constant 0 : index
    %20 = vector.load %arg6[%c0_6, %c0_7] : memref<1x32xf32, #tpu.memory_space<vmem>>, vector<1x32xf32>
    %21 = vector.broadcast %20 : vector<1x32xf32> to vector<16x32xf32>
    %22 = arith.mulf %19, %21 : vector<16x32xf32>
    %c0_8 = arith.constant 0 : index
    %c0_9 = arith.constant 0 : index
    %23 = vector.load %arg7[%c0_8, %c0_9] : memref<1x32xf32, #tpu.memory_space<vmem>>, vector<1x32xf32>
    %24 = vector.broadcast %23 : vector<1x32xf32> to vector<16x32xf32>
    %25 = arith.addf %22, %24 : vector<16x32xf32>
    %26 = arith.truncf %25 : vector<16x32xf32> to vector<16x32xbf16>
    %c0_10 = arith.constant 0 : index
    %c0_11 = arith.constant 0 : index
    %27 = vector.load %arg9[%c0_10, %c0_11] : memref<16x64xf32, #tpu.memory_space<vmem>>, vector<16x64xf32>
    %c0_12 = arith.constant 0 : index
    %c0_13 = arith.constant 0 : index
    %28 = vector.load %arg4[%c0_12, %c0_13] : memref<32x64xf32, #tpu.memory_space<vmem>>, vector<32x64xf32>
    %29 = arith.truncf %28 : vector<32x64xf32> to vector<32x64xbf16>
    %cst_14 = arith.constant dense<0.000000e+00> : vector<16x64xf32>
    %30 = tpu.matmul %26, %29, %cst_14 {dimension_numbers = #tpu.dot_dimension_numbers<[1], [0], [0], [1], [0, 0, 1, 1], [], []>} : vector<16x32xbf16>, vector<32x64xbf16>, vector<16x64xf32> -> vector<16x64xf32>
    %31 = arith.addf %27, %30 : vector<16x64xf32>
    %c0_15 = arith.constant 0 : index
    %c0_16 = arith.constant 0 : index
    %32 = vector.load %arg9[%c0_15, %c0_16] : memref<16x64xf32, #tpu.memory_space<vmem>>, vector<16x64xf32>
    tpu.vector_store %arg9[%c0_15, %c0_16], %31 {strides = array<i32>} : memref<16x64xf32, #tpu.memory_space<vmem>>, vector<16x64xf32>,
    %c0_i32_17 = arith.constant 0 : i32
    %33 = arith.cmpi eq, %arg2, %c0_i32_17 : i32
    %34 = arith.extui %33 : i1 to i32
    %c0_i32_18 = arith.constant 0 : i32
    %35 = arith.cmpi ne, %34, %c0_i32_18 : i32
    scf.if %35 {
      %c0_19 = arith.constant 0 : index
      %c0_20 = arith.constant 0 : index
      %36 = vector.load %arg9[%c0_19, %c0_20] : memref<16x64xf32, #tpu.memory_space<vmem>>, vector<16x64xf32>
      %c0_21 = arith.constant 0 : index
      %c0_22 = arith.constant 0 : index
      %37 = vector.load %arg5[%c0_21, %c0_22] : memref<1x64xf32, #tpu.memory_space<vmem>>, vector<1x64xf32>
      %38 = vector.broadcast %37 : vector<1x64xf32> to vector<16x64xf32>
      %39 = arith.addf %36, %38 : vector<16x64xf32>
      %cst_23 = arith.constant 5.000000e-01 : f32
      %40 = vector.broadcast %cst_23 : f32 to vector<16x64xf32>
      %41 = arith.mulf %40, %39 : vector<16x64xf32>
      %cst_24 = arith.constant 4.471500e-02 : f32
      %42 = vector.broadcast %cst_24 : f32 to vector<16x64xf32>
      %43 = arith.mulf %42, %39 : vector<16x64xf32>
      %44 = arith.mulf %43, %39 : vector<16x64xf32>
      %45 = arith.mulf %44, %39 : vector<16x64xf32>
      %46 = arith.addf %39, %45 : vector<16x64xf32>
      %cst_25 = arith.constant 0.797884583 : f32
      %47 = vector.broadcast %cst_25 : f32 to vector<16x64xf32>
      %48 = arith.mulf %47, %46 : vector<16x64xf32>
      %49 = math.tanh %48 : vector<16x64xf32>
      %cst_26 = arith.constant 1.000000e+00 : f32
      %50 = vector.broadcast %cst_26 : f32 to vector<16x64xf32>
      %51 = arith.addf %50, %49 : vector<16x64xf32>
      %52 = arith.mulf %41, %51 : vector<16x64xf32>
      %c0_27 = arith.constant 0 : index
      %c0_28 = arith.constant 0 : index
      %53 = vector.load %arg8[%c0_27, %c0_28] : memref<16x64xf32, #tpu.memory_space<vmem>>, vector<16x64xf32>
      tpu.vector_store %arg8[%c0_27, %c0_28], %52 {strides = array<i32>} : memref<16x64xf32, #tpu.memory_space<vmem>>, vector<16x64xf32>,
    } else {
    }
    return
  }
  func.func @transform_0(%arg0: i32, %arg1: i32, %arg2: i32) -> (i32, i32) {
    %c0_i32 = arith.constant 0 : i32
    return %arg0, %arg2 : i32, i32
  }
  func.func @transform_1(%arg0: i32, %arg1: i32, %arg2: i32) -> (i32, i32) {
    %c0_i32 = arith.constant 0 : i32
    return %arg2, %arg1 : i32, i32
  }
  func.func @transform_2(%arg0: i32, %arg1: i32, %arg2: i32) -> (i32, i32) {
    %c0_i32 = arith.constant 0 : i32
    %c0_i32_0 = arith.constant 0 : i32
    return %c0_i32, %arg1 : i32, i32
  }
  func.func @transform_3(%arg0: i32, %arg1: i32, %arg2: i32) -> (i32, i32) {
    %c0_i32 = arith.constant 0 : i32
    %c0_i32_0 = arith.constant 0 : i32
    return %c0_i32, %arg2 : i32, i32
  }
  func.func @transform_4(%arg0: i32, %arg1: i32, %arg2: i32) -> (i32, i32) {
    %c0_i32 = arith.constant 0 : i32
    %c0_i32_0 = arith.constant 0 : i32
    return %c0_i32, %arg2 : i32, i32
  }
  func.func @transform_5(%arg0: i32, %arg1: i32, %arg2: i32) -> (i32, i32) {
    %c0_i32 = arith.constant 0 : i32
    return %arg0, %arg1 : i32, i32
  }
}

module attributes {stable_mosaic.version = 11 : i64} {
  func.func @_linear_kernel(%arg0: i32, %arg1: i32, %arg2: i32, %arg3: memref<16x64xf32, #tpu.memory_space<vmem>>, %arg4: memref<64x32xf32, #tpu.memory_space<vmem>>, %arg5: memref<1x32xf32, #tpu.memory_space<vmem>>, %arg6: memref<16x32xf32, #tpu.memory_space<vmem>>, %arg7: memref<16x32xf32, #tpu.memory_space<vmem>>, %arg8: memref<16x32xf32, #tpu.memory_space<vmem>>) attributes {dimension_semantics = [#tpu.dimension_semantics<parallel>, #tpu.dimension_semantics<parallel>, #tpu.dimension_semantics<arbitrary>], iteration_bounds = array<i64: 1, 1, 1>, scalar_prefetch = 0 : i64, scratch_operands = 1 : i64, tpu.core_type = #tpu.core_type<tc>, window_params = [{transform_indices = @transform_0, window_bounds = array<i64: 16, 64>}, {transform_indices = @transform_1, window_bounds = array<i64: 64, 32>}, {transform_indices = @transform_2, window_bounds = array<i64: 1, 32>}, {transform_indices = @transform_3, window_bounds = array<i64: 16, 32>}, {transform_indices = @transform_4, window_bounds = array<i64: 16, 32>}]} {
    %c0_i32 = arith.constant 0 : i32
    %0 = arith.cmpi eq, %arg2, %c0_i32 : i32
    %1 = arith.extui %0 : i1 to i32
    %c0_i32_0 = arith.constant 0 : i32
    %2 = arith.cmpi ne, %1, %c0_i32_0 : i32
    scf.if %2 {
      %cst_10 = arith.constant 0.000000e+00 : f32
      %14 = vector.broadcast %cst_10 : f32 to vector<16x32xf32>
      %c0_11 = arith.constant 0 : index
      %c0_12 = arith.constant 0 : index
      %15 = vector.load %arg8[%c0_11, %c0_12] : memref<16x32xf32, #tpu.memory_space<vmem>>, vector<16x32xf32>
      tpu.vector_store %arg8[%c0_11, %c0_12], %14 {strides = array<i32>} : memref<16x32xf32, #tpu.memory_space<vmem>>, vector<16x32xf32>,
    } else {
    }
    %c0 = arith.constant 0 : index
    %c0_1 = arith.constant 0 : index
    %3 = vector.load %arg3[%c0, %c0_1] : memref<16x64xf32, #tpu.memory_space<vmem>>, vector<16x64xf32>
    %4 = arith.truncf %3 : vector<16x64xf32> to vector<16x64xbf16>
    %c0_2 = arith.constant 0 : index
    %c0_3 = arith.constant 0 : index
    %5 = vector.load %arg8[%c0_2, %c0_3] : memref<16x32xf32, #tpu.memory_space<vmem>>, vector<16x32xf32>
    %c0_4 = arith.constant 0 : index
    %c0_5 = arith.constant 0 : index
    %6 = vector.load %arg4[%c0_4, %c0_5] : memref<64x32xf32, #tpu.memory_space<vmem>>, vector<64x32xf32>
    %7 = arith.truncf %6 : vector<64x32xf32> to vector<64x32xbf16>
    %cst = arith.constant dense<0.000000e+00> : vector<16x32xf32>
    %8 = tpu.matmul %4, %7, %cst {dimension_numbers = #tpu.dot_dimension_numbers<[1], [0], [0], [1], [0, 0, 1, 1], [], []>} : vector<16x64xbf16>, vector<64x32xbf16>, vector<16x32xf32> -> vector<16x32xf32>
    %9 = arith.addf %5, %8 : vector<16x32xf32>
    %c0_6 = arith.constant 0 : index
    %c0_7 = arith.constant 0 : index
    %10 = vector.load %arg8[%c0_6, %c0_7] : memref<16x32xf32, #tpu.memory_space<vmem>>, vector<16x32xf32>
    tpu.vector_store %arg8[%c0_6, %c0_7], %9 {strides = array<i32>} : memref<16x32xf32, #tpu.memory_space<vmem>>, vector<16x32xf32>,
    %c0_i32_8 = arith.constant 0 : i32
    %11 = arith.cmpi eq, %arg2, %c0_i32_8 : i32
    %12 = arith.extui %11 : i1 to i32
    %c0_i32_9 = arith.constant 0 : i32
    %13 = arith.cmpi ne, %12, %c0_i32_9 : i32
    scf.if %13 {
      %c0_10 = arith.constant 0 : index
      %c0_11 = arith.constant 0 : index
      %14 = vector.load %arg8[%c0_10, %c0_11] : memref<16x32xf32, #tpu.memory_space<vmem>>, vector<16x32xf32>
      %c0_12 = arith.constant 0 : index
      %c0_13 = arith.constant 0 : index
      %15 = vector.load %arg5[%c0_12, %c0_13] : memref<1x32xf32, #tpu.memory_space<vmem>>, vector<1x32xf32>
      %16 = vector.broadcast %15 : vector<1x32xf32> to vector<16x32xf32>
      %17 = arith.addf %14, %16 : vector<16x32xf32>
      %c0_14 = arith.constant 0 : index
      %c0_15 = arith.constant 0 : index
      %18 = vector.load %arg6[%c0_14, %c0_15] : memref<16x32xf32, #tpu.memory_space<vmem>>, vector<16x32xf32>
      %19 = arith.addf %17, %18 : vector<16x32xf32>
      %c0_16 = arith.constant 0 : index
      %c0_17 = arith.constant 0 : index
      %20 = vector.load %arg7[%c0_16, %c0_17] : memref<16x32xf32, #tpu.memory_space<vmem>>, vector<16x32xf32>
      tpu.vector_store %arg7[%c0_16, %c0_17], %19 {strides = array<i32>} : memref<16x32xf32, #tpu.memory_space<vmem>>, vector<16x32xf32>,
    } else {
    }
    return
  }
  func.func @transform_0(%arg0: i32, %arg1: i32, %arg2: i32) -> (i32, i32) {
    %c0_i32 = arith.constant 0 : i32
    return %arg0, %arg2 : i32, i32
  }
  func.func @transform_1(%arg0: i32, %arg1: i32, %arg2: i32) -> (i32, i32) {
    %c0_i32 = arith.constant 0 : i32
    return %arg2, %arg1 : i32, i32
  }
  func.func @transform_2(%arg0: i32, %arg1: i32, %arg2: i32) -> (i32, i32) {
    %c0_i32 = arith.constant 0 : i32
    %c0_i32_0 = arith.constant 0 : i32
    return %c0_i32, %arg1 : i32, i32
  }
  func.func @transform_3(%arg0: i32, %arg1: i32, %arg2: i32) -> (i32, i32) {
    %c0_i32 = arith.constant 0 : i32
    return %arg0, %arg1 : i32, i32
  }
  func.func @transform_4(%arg0: i32, %arg1: i32, %arg2: i32) -> (i32, i32) {
    %c0_i32 = arith.constant 0 : i32
    return %arg0, %arg1 : i32, i32
  }
}

</mosaic_0001>

<bundles_post_ra>
// kernel: transformer_causal_layer.6
= control target key start
LH: loop header
LB: loop body
LE: loop exit
PB: predicated region body
PF: predicated region fallthrough
CT: control target
= control target key end

     0   :  { %vm16_vm0 = vcmask 261120   ;;  %s118_s0 = inlined_call_operand.vmem [shape: f32[16,32], index: 0, kind: input, shape index: {}]   ;;  %s119_s1 = inlined_call_operand.vmem [shape: f32[1,32], index: 1, kind: input, shape index: {}]   ;;  %s120_s2 = inlined_call_operand.vmem [shape: f32[1,32], index: 2, kind: input, shape index: {}]   ;;  %s121_s3 = inlined_call_operand.vmem [shape: f32[16,32], index: 3, kind: output, shape index: {}]  }
   0x1   :  { %v14_v0 = vld [vmem:[%s118_s0] sm:$0xff]  ;;  %v15_v1 = vld [vmem:[%s118_s0 + $0x8] sm:$0xff] }
   0x2   :  { %v17_v2 = vsel %vm16_vm0, %v14_v0, 0.0  ;;  %v20_v3 = vsel %vm16_vm0, %v15_v1, 0.0  ;;  %v68_v21 = vld [vmem:[%s119_s1] ss:$0 sm:$0xff] }
   0x3   :  { %18 = vadd.xlane.f32.xlu0 %v17_v2  ;;  %v69_v23 = vld [vmem:[%s120_s2] ss:$0 sm:$0xff] }
   0x7   :  { %21 = vadd.xlane.f32.xlu0 %v20_v3 }
  0x90   :  { %v19_v4 = vpop.xlane.xlu0 %18 }
  0x91   :  { %v24_v5 = vmul.f32 0.03125, %v19_v4 }
  0x93   :  { %v26_v6 = vsub.f32 %v14_v0, %v24_v5 }
  0x94   :  { %v22_v7 = vpop.xlane.xlu0 %21 }
  0x95   :  { %v25_v8 = vmul.f32 0.03125, %v22_v7  ;;  %v28_v9 = vmul.f32 %v26_v6, %v26_v6 }
  0x97   :  { %v27_v10 = vsub.f32 %v15_v1, %v25_v8  ;;  %v30_v11 = vsel %vm16_vm0, %v28_v9, 0.0 }
  0x98   :  { %31 = vadd.xlane.f32.xlu1 %v30_v11 }
  0x99   :  { %v29_v12 = vmul.f32 %v27_v10, %v27_v10 }
  0x9b   :  { %v33_v13 = vsel %vm16_vm0, %v29_v12, 0.0 }
  0x9c   :  { %34 = vadd.xlane.f32.xlu1 %v33_v13 }
 0x125   :  { %v32_v14 = vpop.xlane.xlu1 %31 }
 0x126   :  { %v36_v15 = vmul.f32 0.03125, %v32_v14 }
 0x128   :  { %v38_v16 = vadd.f32 1e-05, %v36_v15 }
 0x129   :  { %v35_v17 = vpop.xlane.xlu1 %34 }
 0x12a   :  { %70 = vrsqrt.f32 %v38_v16  ;;  %v37_v18 = vmul.f32 0.03125, %v35_v17 }
 0x12c   :  { %v39_v19 = vadd.f32 1e-05, %v37_v18 }
 0x12e   :  { %72 = vrsqrt.f32 %v39_v19 }
 0x134   :  { %v71_v20 = vpop.eup %70 }
 0x135   :  { %v42_v22 = vmul.f32 %v71_v20, %v26_v6 }
 0x137   :  { %v51_v24 = vmul.f32 %v68_v21, %v42_v22 }
 0x138   :  { %v73_v25 = vpop.eup %72 }
 0x139   :  { %v60_v26 = vadd.f32 %v69_v23, %v51_v24  ;;  %v43_v27 = vmul.f32 %v73_v25, %v27_v10 }
 0x13b   :  { %62 = vst.msk [vmem:[%s121_s3] sm:$0xff] %vm16_vm0, %v60_v26  ;;  %v52_v28 = vmul.f32 %v68_v21, %v43_v27 }
 0x13d   :  { %v61_v29 = vadd.f32 %v69_v23, %v52_v28 }
 0x13f   :  { %63 = vst.msk [vmem:[%s121_s3 + $0x8] sm:$0xff] %vm16_vm0, %v61_v29 }

// kernel: transformer_causal_layer.7
= control target key start
LH: loop header
LB: loop body
LE: loop exit
PB: predicated region body
PF: predicated region fallthrough
CT: control target
= control target key end

     0   :  { %vm19_vm0 = vcmask 785408   ;;  %v118_v0 = vmov 0.0   ;;  %vm119_vm1 = vmmov 0   ;;  %vm33_vm2 = vcmask 261120   ;;  %s173_s1 = inlined_call_operand.vmem [shape: f32[32,96], index: 1, kind: input, shape index: {}]   ;;  %s174_s0 = inlined_call_operand.vmem [shape: f32[16,32], index: 0, kind: input, shape index: {}]   ;;  %s175_s2 = inlined_call_operand.vmem [shape: f32[1,96], index: 2, kind: input, shape index: {}]   ;;  %s176_s3 = inlined_call_operand.vmem [shape: f32[16,96], index: 3, kind: output, shape index: {}]  }
   0x1   :  { %108 = vmatprep.subr.bf16.mxu0 %v118_v0  ;;  %v27_v1 = vld [vmem:[%s173_s1] sm:$0xff]  ;;  %v28_v2 = vld [vmem:[%s173_s1 + $0x8] sm:$0xff]  ;;  %v29_v3 = vld [vmem:[%s173_s1 + $0x10] sm:$0xff]  ;;  %112 = vmatprep.mubr.msk.bf16.mxu0 %vm119_vm1, %v118_v0  ;;  %20 = vst.msk [vmem:[#allocation2] sm:$0xff] %vm19_vm0, %v118_v0 }
   0x2   :  { %21 = vst.msk [vmem:[#allocation2 + $0x8] sm:$0xff] %vm19_vm0, %v118_v0  ;;  %v31_v4 = vpack.c.bf16 %v28_v2, %v27_v1  ;;  %v30_v5 = vld [vmem:[%s173_s1 + $0x18] sm:$0xff]  ;;  %v22_v7 = vld [vmem:[%s174_s0] sm:$0xff]  ;;  %v23_v8 = vld [vmem:[%s174_s0 + $0x8] sm:$0xff] }
   0x3   :  { %v32_v6 = vpack.c.bf16 %v30_v5, %v29_v3  ;;  %v24_v9 = vpack.c.bf16 %v23_v8, %v22_v7  ;;  %v104_v18 = vld [vmem:[%s175_s2] ss:$0 sm:$0xff] }
   0x4   :  { %109 = vmatpush3.bf16.msra.mxu0 %v31_v4 }
   0x5   :  { %110 = vmatprep.subr.bf16.mxu0 %v118_v0 }
   0x8   :  { %111 = vmatpush3.bf16.msra.mxu0 %v32_v6  ;;  %v25_v10 = vld [vmem:[#allocation2] sm:$0xff] }
   0x9   :  { %v26_v12 = vld [vmem:[#allocation2 + $0x8] sm:$0xff] }
   0xb   :  { %113 = vmatmul.mubr.msk.bf16.vlgmr.msra.gmra.mrb[0].mxu0 %vm33_vm2, %v24_v9 }
  0xde   :  { %v71_v11 = vpop.f32.mrb[0].mxu0 }
  0xdf   :  { %v78_v13 = vadd.f32 %v71_v11, %v25_v10  ;;  %v114_v14 = vpop.f32.mrb[1].mxu0 }
  0xe0   :  { %v74_v15 = vpop.f32.mrb[2].mxu0 }
  0xe1   :  { %81 = vst.msk [vmem:[#allocation2] sm:$0xff] %vm19_vm0, %v78_v13  ;;  %v79_v16 = vadd.f32 %v74_v15, %v26_v12  ;;  %v115_v17 = vpop.f32.mrb[3].mxu0 }
  0xe3   :  { %82 = vst.msk [vmem:[#allocation2 + $0x8] sm:$0xff] %vm19_vm0, %v79_v16 }
  0xe8   :  { %v86_v19 = vld [vmem:[#allocation2] sm:$0xff] }
  0xe9   :  { %v95_v20 = vadd.f32 %v104_v18, %v86_v19 }
  0xea   :  { %v87_v21 = vld [vmem:[#allocation2 + $0x8] sm:$0xff] }
  0xeb   :  { %97 = vst.msk [vmem:[%s176_s3] sm:$0xff] %vm19_vm0, %v95_v20  ;;  %v96_v22 = vadd.f32 %v104_v18, %v87_v21 }
  0xed   :  { %98 = vst.msk [vmem:[%s176_s3 + $0x8] sm:$0xff] %vm19_vm0, %v96_v22 }

// kernel: transformer_causal_layer.8
= control target key start
LH: loop header
LB: loop body
LE: loop exit
PB: predicated region body
PF: predicated region fallthrough
CT: control target
= control target key end

     0   :  { %11 = vsyncpa [#allocation3], 0  ;;  %s1125_s0 = inlined_call_operand.vmem [shape: f32[2,4,8,8], index: 0, kind: input, shape index: {}]   ;;  %s1126_s1 = inlined_call_operand.vmem [shape: f32[2,4,8,8], index: 1, kind: input, shape index: {}]   ;;  %s1127_s2 = inlined_call_operand.vmem [shape: f32[2,4,8,8], index: 2, kind: input, shape index: {}]   ;;  %s1128_s3 = inlined_call_operand.vmem [shape: f32[2,1,8], index: 3, kind: input, shape index: {}]   ;;  %s1129_s4 = inlined_call_operand.vmem [shape: f32[2,4,8,8], index: 4, kind: output, shape index: {0}]   ;;  %s1130_s5 = inlined_call_operand.hbm [shape: f32[2,8,8], index: 5, kind: output, shape index: {1}]  }
   0x1   :  { %13 = vsyncpa [#allocation3 + $0x1], 0  ;;  %s957_s18 = smov 0   ;;  %s959_s19 = smov 0  }
   0x2   :  { %s961_s20 = smov 0   ;;  %s963_s21 = smov 0  }
   0x3   :  { %s965_s22 = smov 0   ;;  %s967_s23 = smov 0  }
   0x4   :  { %s969_s24 = smov 0   ;;  %s971_s25 = smov 0  }
   0x5 LB: > { %s711_s26 = sadd.s32 4294967295, %s921_s25   ;;  %s712_s27 = sadd.s32 4294967294, %s921_s25   ;;  %s921_s25 = sphi %s971_s25, %s19_s25   ;;  %s917_s24 = sphi %s969_s24, %s1141_s24   ;;  %s913_s23 = sphi %s967_s23, %s1140_s23   ;;  %s909_s22 = sphi %s965_s22, %s1139_s22   ;;  %s905_s21 = sphi %s963_s21, %s1138_s21   ;;  %s901_s20 = sphi %s961_s20, %s1137_s20   ;;  %s897_s19 = sphi %s959_s19, %s1136_s19   ;;  %s893_s18 = sphi %s957_s18, %s1135_s18  }
   0x6   : > { %s31_s28 = sadd.s32 1, %s913_s23  ;;  %s38_s29 = sadd.s32 1, %s917_s24 }
   0x7   : > { %p32_p0 = scmp.ge.s32.totalorder %s31_s28, 4  ;;  %p199_p1 = scmp.ne.s32.totalorder %s901_s20, %s897_s19 }
   0x8   : > { %p200_p2 = scmp.eq.s32.totalorder %s711_s26, 7  ;;  %p205_p4 = scmp.ne.s32.totalorder %s897_s19, %s893_s18 }
   0x9   : > { %s1143_s28 = smov (%p32_p0, %s31_s28), 0  ;;  %s1145_s29 = smov (!%p32_p0, %s38_s29), %s917_s24 }
   0xa   : > { %p1006_p3 = por %p200_p2, %p199_p1  ;;  %p40_p5 = scmp.ge.s32.totalorder %s1145_s29, 2 }
   0xb   : > { %p206_p6 = scmp.eq.s32.totalorder %s712_s27, 7  ;;  %p715_p7 = scmp.ge.s32.totalorder %s921_s25, 1 }
   0xc   : > { %p266_p8 = scmp.lt.s32.totalorder %s921_s25, 9  ;;  %s1147_s29 = smov (%p40_p5, %s1145_s29), 0 }
   0xd   : > { %p1016_p9 = por %p206_p6, %p205_p4  ;;  %s184_s7 = ssub.s32 %s917_s24, %s1147_s29 }
   0xe   : > { %p267_p10 = pnand %p715_p7, %p266_p8  ;;  %s189_s8 = sadd.s32 1, %s901_s20 }
   0xf   : > { %p187_p11 = scmp.eq.s32.totalorder %s184_s7, 0  ;;  %s1131_s10 = sand.u32 (!%p267_p10), 1, %s897_s19   ;;  %v923_v0 = vmov (!%p267_p10), 0.0   ;;  %vm924_vm0 = vmmov (!%p267_p10), 0   ;;  %vm385_vm1 = vcmask (!%p267_p10), 64512   ;;  %v432_v7 = vlaneseq (!%p267_p10) }
  0x10   : > { %270 = sbr.rel (%p267_p10) target bundleno = 811 (0x32b), region = 36  ;;  %p330_p12 = scmp.lt.s32.totalorder (!%p267_p10), %s909_s22, 1  ;;  %737 = vmatprep.subr.bf16.mxu0 (!%p267_p10), %v923_v0  ;;  %739 = vmatprep.mubr.msk.bf16.mxu0 (!%p267_p10), %vm924_vm0, %v923_v0  ;;  %vm457_vm3 = vcmask (!%p267_p10), 1043456  }
  0x11   : > { %s1024_s9 = scalar_select %p187_p11, %s901_s20, %s189_s8  }
  0x12   : > { %s1030_s11 = sshll.u32 (!%p267_p10), %s1131_s10, 3  ;;  %p332_p13 = scmp.lt.s32.totalorder (!%p267_p10), %s905_s21, 3  ;;  %743 = vmatprep.subr.bf16.mxu1 (!%p267_p10), %v923_v0  ;;  %745 = vmatprep.mubr.msk.bf16.mxu1 (!%p267_p10), %vm924_vm0, %v923_v0  ;;  %v433_v8 = vshrl.u32 (!%p267_p10), %v432_v7, 7  ;;  %v437_v9 = vand.u32 (!%p267_p10), 127, %v432_v7 }
  0x13   : > { %s329_s8 = scalar_lea.vmem (!%p267_p10), [#allocation2], %s1030_s11  ;;  %p728_p0 = scmp.ne.s32.totalorder (!%p267_p10), %s905_s21, 0 }
  0x14   : > { %vm438_vm2 = vcmp.le.s32.totalorder (!%p267_p10), %v437_v9, %v433_v8 }
  0x17   : > { %s331_s12 = scalar_select %p330_p12, %s909_s22, 1 }
  0x18   : > { %s333_s13 = scalar_select %p332_p13, %s905_s21, 3 }
  0x19   : > { %s717_s14 = sshll.u32 %s331_s12, 2  ;;  %v925_v34 = vmov (!%p728_p0), 0.0  }
  0x1a   : > { %s338_s15 = sadd.s32 %s717_s14, %s333_s13  ;;  %506 = vst.msk [vmem:[%s329_s8] sm:$0xff] (!%p728_p0), %vm385_vm1, %v925_v34 }
  0x1b   : > { %s1035_s16 = sshll.u32 %s338_s15, 3  ;;  %s359_s15 = scalar_lea.vmem %s1128_s3, %s331_s12 }
  0x1c   : > { %s348_s27 = scalar_lea.vmem %s1126_s1, %s1035_s16  ;;  %s340_s10 = scalar_lea.vmem %s1125_s0, %s1035_s16  ;;  %v725_v10 = vld [vmem:[%s359_s15] ss:$0 sm:$0xff] }
  0x1d   : > { %v376_v1 = vld [vmem:[%s348_s27] sm:$0xff]  ;;  %s356_s17 = scalar_lea.vmem %s1127_s2, %s1035_s16  ;;  %s370_s7 = scalar_lea.vmem %s1129_s4, %s1035_s16 }
  0x1e   : > { %v373_v2 = vld [vmem:[%s340_s10] sm:$0xff]  ;;  %v377_v3 = vpack.c.bf16 %v376_v1, %v376_v1 }
  0x1f   : > { %v374_v5 = vmul.f32 0.35355338, %v373_v2  ;;  %v452_v23 = vld [vmem:[%s356_s17] sm:$0xff] }
  0x20   : > { %v390_v4 = vsel %vm385_vm1, %v377_v3, 0  ;;  %v453_v24 = vpack.c.bf16 %v452_v23, %v452_v23 }
  0x21   : > { %738 = vmatpush3.bf16.xpose.msra.mxu0 %v390_v4  ;;  %v375_v6 = vpack.c.bf16 %v374_v5, %v374_v5 }
  0x22   : > { %v459_v25 = vsel %vm457_vm3, %v453_v24, 0 }
  0x23   : > { %744 = vmatpush3.bf16.msra.mxu1 %v459_v25 }
  0x28   : > { %740 = vmatmul.mubr.msk.bf16.vlgmr.msra.gmra.mrb[0].mxu0 %vm385_vm1, %v375_v6 }
  0xfb   : > { %v426_v11 = vpop.f32.mrb[0].mxu0 }
  0xfc   : > { %v427_v12 = vadd.f32 %v725_v10, %v426_v11  ;;  %v741_v13 = vpop.f32.mrb[1].mxu0 }
  0xfd   : > { %v429_v14 = vpop.f32.mrb[2].mxu0 }
  0xfe   : > { %v742_v15 = vpop.f32.mrb[3].mxu0  ;;  %v439_v16 = vsel %vm438_vm2, %v427_v12, -1e+30 }
  0xff   : > { %v440_v17 = vsel %vm385_vm1, %v439_v16, -inf }
 0x100   : > { %441 = vmax.xlane.f32.xlu0 %v440_v17 }
 0x18d   : > { %v442_v18 = vpop.xlane.xlu0 %441 }
 0x18e   : > { %v443_v19 = vsub.f32 %v439_v16, %v442_v18 }
 0x190   : > { %v444_v20 = vmul.f32 1.442695, %v443_v19 }
 0x192   : > { %823 = vpow2.f32 %v444_v20 }
 0x19c   : > { %v824_v21 = vpop.eup %823 }
 0x19d   : > { %v446_v22 = vsel %vm385_vm1, %v824_v21, 0.0 }
 0x19e   : > { %447 = vadd.xlane.f32.xlu0 %v446_v22 }
 0x22b   : > { %v448_v26 = vpop.xlane.xlu0 %447 }
 0x22c   : > { %825 = vrcp.f32 %v448_v26 }
 0x236   : > { %v826_v27 = vpop.eup %825 }
 0x237   : > { %v450_v28 = vmul.f32 %v826_v27, %v824_v21 }
 0x239   : > { %v451_v29 = vpack.c.bf16 %v450_v28, %v450_v28 }
 0x23b   : > { %746 = vmatmul.mubr.msk.bf16.vlgmr.msra.gmra.mrb[0].mxu1 %vm385_vm1, %v451_v29 }
 0x30b   : > { %505 = sbr.rel (%p728_p0) target bundleno = 786 (0x312), region = 40 }
 0x30e   : > { %v495_v30 = vpop.f32.mrb[0].mxu1 }
 0x30f   : > { %501 = vst.msk [vmem:[%s370_s7] sm:$0xff] %vm385_vm1, %v495_v30  ;;  %v747_v31 = vpop.f32.mrb[1].mxu1 }
 0x310   : > { %v498_v32 = vpop.f32.mrb[2].mxu1 }
 0x311   : > { %v748_v33 = vpop.f32.mrb[3].mxu1 }
 0x312 PF: > { %v507_v35 = vld [vmem:[%s329_s8] sm:$0xff]  ;;  %v508_v36 = vmul.f32 0.25, %v450_v28  ;;  %s730_s16 = sshll.u32 %s909_s22, 7  ;;  %s540_s13 = sshll.u32 %s329_s8, 4  ;;  %s1071_s13 = int_to_ptr.vmem [resolvable:$true] %s540_s13 }
 0x313   : > { %s1069_s10 = scalar_lea.hbm %s1130_s5, %s730_s16  ;;  %s1134_s21 = sand.u32 1, %s897_s19  }
 0x314   : > { %v509_v37 = vadd.f32 %v508_v36, %v507_v35  ;;  %s523_s11 = scalar_lea.sflag [#allocation3], %s1134_s21  ;;  %s827_s12 = scalar_lea.vmem %s1071_s13, 128 }
 0x315   : > { %p828_p1 = scmp.ne.s32.totalorder %s1071_s13, %s827_s12  ;;  %s926_s22 = smov [#allocation2]  }
 0x316   : > { %510 = vst.msk [vmem:[%s329_s8] sm:$0xff] %vm385_vm1, %v509_v37  ;;  %s831_s17 = sshll.u32 %s926_s22, 4  ;;  %s832_s17 = int_to_ptr.vmem [resolvable:$false] %s831_s17 }
 0x317   : > { %p829_p2 = pnand %p828_p1, %p1006_p3  ;;  %s833_s26 = scalar_lea.vmem %s832_s17, 256 }
 0x318   : > { %p834_p5 = scmp.lt.s32.totalorder %s1071_s13, %s832_s17  ;;  %p835_p6 = scmp.lt.s32.totalorder %s833_s26, %s827_s12 }
 0x319   : > { %p830_p4 = pneg %p829_p2 }
 0x31a   : > { %p836_p7 = por %p835_p6, %p834_p5 }
 0x31c   : > { %p837_p8 = pnand %p836_p7, %p830_p4 }
 0x31e   : > { %840 = shalt.err (!%p837_p8)
}
 0x31f   : > { %s841_s27 = scalar_lea.hbm %s1069_s10, 128  ;;  %s845_s16 = scalar_lea.hbm %s1130_s5, 256 }
 0x320   : > { %p842_p10 = scmp.ne.s32.totalorder %s1069_s10, %s841_s27  ;;  %p846_p13 = scmp.lt.u32.totalorder %s1069_s10, %s1130_s5 }
 0x321   : > { %p847_p0 = scmp.lt.u32.totalorder %s845_s16, %s841_s27  ;;  %p849_p2 = scmp.lt.u32.totalorder %s841_s27, %s1069_s10 }
 0x322   : > { %p843_p11 = pnand %p842_p10, %p1006_p3 }
 0x323   : > { %p848_p1 = por %p847_p0, %p846_p13 }
 0x324   : > { %p844_p12 = pneg %p843_p11 }
 0x325   : > { %p850_p4 = por %p849_p2, %p848_p1 }
 0x327   : > { %p851_p5 = pnand %p850_p4, %p844_p12 }
 0x329   : > { %854 = shalt.err (!%p851_p5)
}
 0x32a   : > { %749 = dma.vmem_to_hbm [thread:$0]  (%p1006_p3), %s1071_s13, 128, %s1069_s10, %s523_s11  }
 0x32b PF: > { %p755_p6 = scmp.ge.s32.totalorder %s921_s25, 2  ;;  %s566_s21 = sand.u32 1, %s893_s18  }
 0x32c   : > { %s567_s12 = scalar_lea.sflag [#allocation3], %s566_s21 }
 0x32d   : > { %p752_p7 = pnand %p755_p6, %p1016_p9 }
 0x32f   : > { %888 = dma.done.wait (!%p752_p7), %s567_s12, 128  }
 0x330   : > { %890 = vsyncadd (!%p752_p7), %s567_s12, 4294967168  ;;  %s19_s25 = sadd.s32 1, %s921_s25   ;;  %s1135_s18 = smov %s897_s19 }
 0x331   : > { %p16_p8 = scmp.ge.s32.totalorder %s19_s25, 10   ;;  %s1136_s19 = smov %s901_s20 }
 0x332   : > { %s1137_s20 = smov %s1024_s9  ;;  %s1138_s21 = smov %s913_s23 }
 0x333   : > { %s1139_s22 = smov %s917_s24  ;;  %s1140_s23 = smov %s1143_s28 }
 0x334   : > { %s1141_s24 = smov %s1147_s29  ;;  %18 = sbr.rel (!%p16_p8) target bundleno = 5 (0x5), region = 96 }
 0x33b   :  { %572 = vsyncpa [#allocation3], 1 }
 0x33c   :  { %574 = vsyncpa [#allocation3 + $0x1], 1 }

// kernel: transformer_causal_layer.9
= control target key start
LH: loop header
LB: loop body
LE: loop exit
PB: predicated region body
PF: predicated region fallthrough
CT: control target
= control target key end

     0   :  { %vm22_vm0 = vcmask 261120   ;;  %v124_v0 = vmov 0.0   ;;  %vm125_vm1 = vmmov 0   ;;  %s191_s1 = inlined_call_operand.vmem [shape: f32[32,32], index: 1, kind: input, shape index: {}]   ;;  %s192_s0 = inlined_call_operand.vmem [shape: f32[16,32], index: 0, kind: input, shape index: {}]   ;;  %s193_s2 = inlined_call_operand.vmem [shape: f32[1,32], index: 2, kind: input, shape index: {}]   ;;  %s194_s3 = inlined_call_operand.vmem [shape: f32[16,32], index: 3, kind: input, shape index: {}]   ;;  %s195_s4 = inlined_call_operand.vmem [shape: f32[16,32], index: 4, kind: output, shape index: {}]  }
   0x1   :  { %114 = vmatprep.subr.bf16.mxu0 %v124_v0  ;;  %v30_v1 = vld [vmem:[%s191_s1] sm:$0xff]  ;;  %v31_v2 = vld [vmem:[%s191_s1 + $0x8] sm:$0xff]  ;;  %v32_v3 = vld [vmem:[%s191_s1 + $0x10] sm:$0xff]  ;;  %118 = vmatprep.mubr.msk.bf16.mxu0 %vm125_vm1, %v124_v0  ;;  %23 = vst.msk [vmem:[#allocation2] sm:$0xff] %vm22_vm0, %v124_v0 }
   0x2   :  { %24 = vst.msk [vmem:[#allocation2 + $0x8] sm:$0xff] %vm22_vm0, %v124_v0  ;;  %v34_v4 = vpack.c.bf16 %v31_v2, %v30_v1  ;;  %v33_v5 = vld [vmem:[%s191_s1 + $0x18] sm:$0xff]  ;;  %v25_v7 = vld [vmem:[%s192_s0] sm:$0xff]  ;;  %v26_v8 = vld [vmem:[%s192_s0 + $0x8] sm:$0xff] }
   0x3   :  { %v35_v6 = vpack.c.bf16 %v33_v5, %v32_v3  ;;  %v27_v9 = vpack.c.bf16 %v26_v8, %v25_v7  ;;  %v110_v18 = vld [vmem:[%s193_s2] ss:$0 sm:$0xff]  ;;  %v100_v23 = vld [vmem:[%s194_s3 + $0x8] sm:$0xff] }
   0x4   :  { %115 = vmatpush3.bf16.msra.mxu0 %v34_v4  ;;  %v99_v20 = vld [vmem:[%s194_s3] sm:$0xff] }
   0x5   :  { %116 = vmatprep.subr.bf16.mxu0 %v124_v0 }
   0x8   :  { %117 = vmatpush3.bf16.msra.mxu0 %v35_v6  ;;  %v28_v10 = vld [vmem:[#allocation2] sm:$0xff] }
   0x9   :  { %v29_v12 = vld [vmem:[#allocation2 + $0x8] sm:$0xff] }
   0xb   :  { %119 = vmatmul.mubr.msk.bf16.vlgmr.msra.gmra.mrb[0].mxu0 %vm22_vm0, %v27_v9 }
  0xde   :  { %v74_v11 = vpop.f32.mrb[0].mxu0 }
  0xdf   :  { %v81_v13 = vadd.f32 %v74_v11, %v28_v10  ;;  %v120_v14 = vpop.f32.mrb[1].mxu0 }
  0xe0   :  { %v77_v15 = vpop.f32.mrb[2].mxu0 }
  0xe1   :  { %83 = vst.msk [vmem:[#allocation2] sm:$0xff] %vm22_vm0, %v81_v13  ;;  %v82_v16 = vadd.f32 %v77_v15, %v29_v12  ;;  %v121_v17 = vpop.f32.mrb[3].mxu0 }
  0xe3   :  { %84 = vst.msk [vmem:[#allocation2 + $0x8] sm:$0xff] %vm22_vm0, %v82_v16 }
  0xe8   :  { %v88_v19 = vld [vmem:[#allocation2] sm:$0xff] }
  0xe9   :  { %v97_v21 = vadd.f32 %v110_v18, %v88_v19 }
  0xea   :  { %v89_v22 = vld [vmem:[#allocation2 + $0x8] sm:$0xff] }
  0xeb   :  { %v101_v24 = vadd.f32 %v99_v20, %v97_v21  ;;  %v98_v25 = vadd.f32 %v110_v18, %v89_v22 }
  0xed   :  { %103 = vst.msk [vmem:[%s195_s4] sm:$0xff] %vm22_vm0, %v101_v24  ;;  %v102_v26 = vadd.f32 %v100_v23, %v98_v25 }
  0xef   :  { %104 = vst.msk [vmem:[%s195_s4 + $0x8] sm:$0xff] %vm22_vm0, %v102_v26 }

// kernel: transformer_causal_layer.10
= control target key start
LH: loop header
LB: loop body
LE: loop exit
PB: predicated region body
PF: predicated region fallthrough
CT: control target
= control target key end

     0   :  { %vm30_vm0 = vcmask 261120   ;;  %v197_v17 = vmov 0.0   ;;  %vm198_vm1 = vmmov 0   ;;  %vm25_vm2 = vcmask 523264   ;;  %s273_s0 = inlined_call_operand.vmem [shape: f32[16,32], index: 0, kind: input, shape index: {}]   ;;  %s274_s1 = inlined_call_operand.vmem [shape: f32[32,64], index: 1, kind: input, shape index: {}]   ;;  %s275_s3 = inlined_call_operand.vmem [shape: f32[1,32], index: 3, kind: input, shape index: {}]   ;;  %s276_s4 = inlined_call_operand.vmem [shape: f32[1,32], index: 4, kind: input, shape index: {}]   ;;  %s277_s2 = inlined_call_operand.vmem [shape: f32[1,64], index: 2, kind: input, shape index: {}]   ;;  %s278_s5 = inlined_call_operand.vmem [shape: f32[16,64], index: 5, kind: output, shape index: {}]  }
   0x1   :  { %v28_v0 = vld [vmem:[%s273_s0] sm:$0xff]  ;;  %v29_v1 = vld [vmem:[%s273_s0 + $0x8] sm:$0xff]  ;;  %179 = vmatprep.subr.bf16.mxu0 %v197_v17  ;;  %v81_v18 = vld [vmem:[%s274_s1 + $0x10] sm:$0xff]  ;;  %183 = vmatprep.mubr.msk.bf16.mxu0 %vm198_vm1, %v197_v17  ;;  %26 = vst.msk [vmem:[#allocation2] sm:$0xff] %vm25_vm2, %v197_v17 }
   0x2   :  { %v31_v2 = vsel %vm30_vm0, %v28_v0, 0.0  ;;  %v34_v3 = vsel %vm30_vm0, %v29_v1, 0.0  ;;  %v79_v14 = vld [vmem:[%s274_s1] sm:$0xff]  ;;  %v80_v15 = vld [vmem:[%s274_s1 + $0x8] sm:$0xff]  ;;  %v82_v19 = vld [vmem:[%s274_s1 + $0x18] sm:$0xff]  ;;  %27 = vst.msk [vmem:[#allocation2 + $0x8] sm:$0xff] %vm25_vm2, %v197_v17 }
   0x3   :  { %32 = vadd.xlane.f32.xlu0 %v31_v2  ;;  %v83_v16 = vpack.c.bf16 %v80_v15, %v79_v14  ;;  %v84_v20 = vpack.c.bf16 %v82_v19, %v81_v18  ;;  %v172_v29 = vld [vmem:[%s275_s3] ss:$0 sm:$0xff] }
   0x4   :  { %v173_v33 = vld [vmem:[%s276_s4] ss:$0 sm:$0xff] }
   0x5   :  { %180 = vmatpush3.bf16.msra.mxu0 %v83_v16  ;;  %v175_v46 = vld [vmem:[%s277_s2] ss:$0 sm:$0xff] }
   0x6   :  { %181 = vmatprep.subr.bf16.mxu0 %v197_v17 }
   0x7   :  { %35 = vadd.xlane.f32.xlu0 %v34_v3 }
   0x8   :  { %v77_v38 = vld [vmem:[#allocation2] sm:$0xff] }
   0x9   :  { %182 = vmatpush3.bf16.msra.mxu0 %v84_v20  ;;  %v78_v40 = vld [vmem:[#allocation2 + $0x8] sm:$0xff] }
  0x90   :  { %v33_v4 = vpop.xlane.xlu0 %32 }
  0x91   :  { %v38_v5 = vmul.f32 0.03125, %v33_v4 }
  0x93   :  { %v40_v6 = vsub.f32 %v28_v0, %v38_v5 }
  0x94   :  { %v36_v7 = vpop.xlane.xlu0 %35 }
  0x95   :  { %v39_v8 = vmul.f32 0.03125, %v36_v7  ;;  %v42_v9 = vmul.f32 %v40_v6, %v40_v6 }
  0x97   :  { %v41_v10 = vsub.f32 %v29_v1, %v39_v8  ;;  %v44_v11 = vsel %vm30_vm0, %v42_v9, 0.0 }
  0x98   :  { %45 = vadd.xlane.f32.xlu1 %v44_v11 }
  0x99   :  { %v43_v12 = vmul.f32 %v41_v10, %v41_v10 }
  0x9b   :  { %v47_v13 = vsel %vm30_vm0, %v43_v12, 0.0 }
  0x9c   :  { %48 = vadd.xlane.f32.xlu1 %v47_v13 }
 0x125   :  { %v46_v21 = vpop.xlane.xlu1 %45 }
 0x126   :  { %v50_v22 = vmul.f32 0.03125, %v46_v21 }
 0x128   :  { %v52_v23 = vadd.f32 1e-05, %v50_v22 }
 0x129   :  { %v49_v24 = vpop.xlane.xlu1 %48 }
 0x12a   :  { %189 = vrsqrt.f32 %v52_v23  ;;  %v51_v25 = vmul.f32 0.03125, %v49_v24 }
 0x12c   :  { %v53_v26 = vadd.f32 1e-05, %v51_v25 }
 0x12e   :  { %191 = vrsqrt.f32 %v53_v26 }
 0x134   :  { %v190_v27 = vpop.eup %189 }
 0x135   :  { %v56_v28 = vmul.f32 %v190_v27, %v40_v6 }
 0x137   :  { %v65_v32 = vmul.f32 %v172_v29, %v56_v28 }
 0x138   :  { %v192_v30 = vpop.eup %191 }
 0x139   :  { %v57_v31 = vmul.f32 %v192_v30, %v41_v10  ;;  %v74_v35 = vadd.f32 %v173_v33, %v65_v32 }
 0x13b   :  { %v66_v34 = vmul.f32 %v172_v29, %v57_v31 }
 0x13d   :  { %v75_v36 = vadd.f32 %v173_v33, %v66_v34 }
 0x13f   :  { %v76_v37 = vpack.c.bf16 %v75_v36, %v74_v35 }
 0x141   :  { %184 = vmatmul.mubr.msk.bf16.vlgmr.msra.gmra.mrb[0].mxu0 %vm30_vm0, %v76_v37 }
 0x214   :  { %v122_v39 = vpop.f32.mrb[0].mxu0 }
 0x215   :  { %v129_v41 = vadd.f32 %v122_v39, %v77_v38  ;;  %v185_v42 = vpop.f32.mrb[1].mxu0 }
 0x216   :  { %v125_v43 = vpop.f32.mrb[2].mxu0 }
 0x217   :  { %132 = vst.msk [vmem:[#allocation2] sm:$0xff] %vm25_vm2, %v129_v41  ;;  %v130_v44 = vadd.f32 %v125_v43, %v78_v40  ;;  %v186_v45 = vpop.f32.mrb[3].mxu0 }
 0x219   :  { %133 = vst.msk [vmem:[#allocation2 + $0x8] sm:$0xff] %vm25_vm2, %v130_v44 }
 0x21e   :  { %v137_v47 = vld [vmem:[#allocation2] sm:$0xff] }
 0x21f   :  { %v146_v48 = vadd.f32 %v175_v46, %v137_v47 }
 0x220   :  { %v138_v49 = vld [vmem:[#allocation2 + $0x8] sm:$0xff] }
 0x221   :  { %v150_v50 = vmul.f32 0.044715, %v146_v48  ;;  %v147_v51 = vadd.f32 %v175_v46, %v138_v49  ;;  %v148_v62 = vmul.f32 0.5, %v146_v48 }
 0x223   :  { %v152_v52 = vmul.f32 %v150_v50, %v146_v48  ;;  %v151_v53 = vmul.f32 0.044715, %v147_v51  ;;  %v149_v2 = vmul.f32 0.5, %v147_v51 }
 0x225   :  { %v154_v54 = vmul.f32 %v152_v52, %v146_v48  ;;  %v153_v55 = vmul.f32 %v151_v53, %v147_v51 }
 0x227   :  { %v156_v56 = vadd.f32 %v154_v54, %v146_v48  ;;  %v155_v57 = vmul.f32 %v153_v55, %v147_v51 }
 0x229   :  { %v158_v58 = vmul.f32 0.7978846, %v156_v56  ;;  %v157_v59 = vadd.f32 %v155_v57, %v147_v51 }
 0x22b   :  { %193 = vtanh.f32 %v158_v58  ;;  %v159_v60 = vmul.f32 0.7978846, %v157_v59 }
 0x22d   :  { %195 = vtanh.f32 %v159_v60 }
 0x235   :  { %v194_v61 = vpop.eup %193 }
 0x236   :  { %v162_v63 = vadd.f32 1.0, %v194_v61 }
 0x237   :  { %v196_v0 = vpop.eup %195 }
 0x238   :  { %v164_v1 = vmul.f32 %v162_v63, %v148_v62  ;;  %v163_v3 = vadd.f32 1.0, %v196_v0 }
 0x23a   :  { %166 = vst.msk [vmem:[%s278_s5] sm:$0xff] %vm25_vm2, %v164_v1  ;;  %v165_v4 = vmul.f32 %v163_v3, %v149_v2 }
 0x23c   :  { %167 = vst.msk [vmem:[%s278_s5 + $0x8] sm:$0xff] %vm25_vm2, %v165_v4 }

// kernel: transformer_causal_layer.11
= control target key start
LH: loop header
LB: loop body
LE: loop exit
PB: predicated region body
PF: predicated region fallthrough
CT: control target
= control target key end

     0   :  { %v177_v3 = vmov 0.0   ;;  %vm178_vm0 = vmmov 0   ;;  %vm23_vm1 = vcmask 261120   ;;  %s264_s0 = inlined_call_operand.vmem [shape: f32[16,64], index: 0, kind: input, shape index: {}]   ;;  %s265_s1 = inlined_call_operand.vmem [shape: f32[64,32], index: 1, kind: input, shape index: {}]   ;;  %s266_s2 = inlined_call_operand.vmem [shape: f32[1,32], index: 2, kind: input, shape index: {}]   ;;  %s267_s3 = inlined_call_operand.vmem [shape: f32[16,32], index: 3, kind: input, shape index: {}]   ;;  %s268_s4 = inlined_call_operand.hbm [shape: f32[16,32], index: 4, kind: output, shape index: {}]  }
   0x1   :  { %v31_v0 = vld [vmem:[%s265_s1] sm:$0xff]  ;;  %v32_v1 = vld [vmem:[%s265_s1 + $0x8] sm:$0xff]  ;;  %v33_v2 = vld [vmem:[%s265_s1 + $0x10] sm:$0xff]  ;;  %136 = vmatprep.subr.bf16.mxu0 %v177_v3  ;;  %144 = vmatprep.mubr.msk.bf16.mxu0 %vm178_vm0, %v177_v3  ;;  %24 = vst.msk [vmem:[#allocation2] sm:$0xff] %vm23_vm1, %v177_v3 }
   0x2   :  { %v39_v4 = vpack.c.bf16 %v32_v1, %v31_v0  ;;  %v34_v5 = vld [vmem:[%s265_s1 + $0x18] sm:$0xff]  ;;  %25 = vst.msk [vmem:[#allocation2 + $0x8] sm:$0xff] %vm23_vm1, %v177_v3 }
   0x3   :  { %v40_v6 = vpack.c.bf16 %v34_v5, %v33_v2 }
   0x4   :  { %137 = vmatpush3.bf16.msra.mxu0 %v39_v4 }
   0x5   :  { %9 = vsyncpa [#allocation4], 0  ;;  %138 = vmatprep.subr.bf16.mxu0 %v177_v3  ;;  %v35_v7 = vld [vmem:[%s265_s1 + $0x20] sm:$0xff]  ;;  %v36_v8 = vld [vmem:[%s265_s1 + $0x28] sm:$0xff]  ;;  %vm43_vm2 = vcmask 523264   ;;  %s179_s11 = smov [#allocation3]  }
   0x6   :  { %v41_v9 = vpack.c.bf16 %v36_v8, %v35_v7  ;;  %v37_v10 = vld [vmem:[%s265_s1 + $0x30] sm:$0xff]  ;;  %v38_v11 = vld [vmem:[%s265_s1 + $0x38] sm:$0xff]  ;;  %v26_v13 = vld [vmem:[%s264_s0] sm:$0xff]  ;;  %s118_s12 = sshll.u32 %s179_s11, 4  ;;  %s119_s12 = int_to_ptr.vmem [resolvable:$true] %s118_s12 }
   0x7   :  { %v42_v12 = vpack.c.bf16 %v38_v11, %v37_v10  ;;  %v27_v14 = vld [vmem:[%s264_s0 + $0x8] sm:$0xff]  ;;  %v130_v24 = vld [vmem:[%s266_s2] ss:$0 sm:$0xff]  ;;  %s153_s2 = scalar_lea.vmem %s119_s12, 256  ;;  %p158_p1 = scmp.lt.s32.totalorder %s119_s12, %s119_s12 }
   0x8   :  { %139 = vmatpush3.bf16.msra.mxu0 %v40_v6  ;;  %v28_v15 = vpack.c.bf16 %v27_v14, %v26_v13  ;;  %v29_v16 = vld [vmem:[#allocation2] sm:$0xff]  ;;  %v108_v29 = vld [vmem:[%s267_s3 + $0x8] sm:$0xff]  ;;  %p154_p0 = scmp.ne.s32.totalorder %s119_s12, %s153_s2  ;;  %p159_p2 = scmp.lt.s32.totalorder %s153_s2, %s153_s2 }
   0x9   :  { %140 = vmatprep.subr.bf16.mxu0 %v177_v3  ;;  %v30_v18 = vld [vmem:[#allocation2 + $0x8] sm:$0xff]  ;;  %v107_v26 = vld [vmem:[%s267_s3] sm:$0xff] }
   0xa   :  { %p160_p3 = por %p159_p2, %p158_p1 }
   0xc   :  { %141 = vmatpush3.bf16.msra.mxu0 %v41_v9  ;;  %p161_p4 = pnand %p160_p3, %p154_p0 }
   0xd   :  { %142 = vmatprep.subr.bf16.mxu0 %v177_v3 }
  0x10   :  { %143 = vmatpush3.bf16.msra.mxu0 %v42_v12 }
  0x13   :  { %145 = vmatmul.mubr.msk.bf16.vlgmr.msra.gmra.mrb[0].mxu0 %vm43_vm2, %v28_v15 }
  0xe6   :  { %v81_v17 = vpop.f32.mrb[0].mxu0 }
  0xe7   :  { %v88_v19 = vadd.f32 %v81_v17, %v29_v16  ;;  %v146_v20 = vpop.f32.mrb[1].mxu0 }
  0xe8   :  { %v84_v21 = vpop.f32.mrb[2].mxu0 }
  0xe9   :  { %91 = vst.msk [vmem:[#allocation2] sm:$0xff] %vm23_vm1, %v88_v19  ;;  %v89_v22 = vadd.f32 %v84_v21, %v30_v18  ;;  %v147_v23 = vpop.f32.mrb[3].mxu0 }
  0xeb   :  { %92 = vst.msk [vmem:[#allocation2 + $0x8] sm:$0xff] %vm23_vm1, %v89_v22 }
  0xf0   :  { %v96_v25 = vld [vmem:[#allocation2] sm:$0xff] }
  0xf1   :  { %v105_v27 = vadd.f32 %v130_v24, %v96_v25 }
  0xf2   :  { %v97_v28 = vld [vmem:[#allocation2 + $0x8] sm:$0xff] }
  0xf3   :  { %v106_v30 = vadd.f32 %v130_v24, %v97_v28  ;;  %v109_v31 = vadd.f32 %v107_v26, %v105_v27 }
  0xf5   :  { %v110_v32 = vadd.f32 %v108_v29, %v106_v30  ;;  %111 = vst.msk [vmem:[#allocation3] sm:$0xff] %vm23_vm1, %v109_v31 }
  0xf7   :  { %112 = vst.msk [vmem:[#allocation3 + $0x8] sm:$0xff] %vm23_vm1, %v110_v32 }
  0xf8   :  { %164 = shalt.err (!%p161_p4)
}
  0xf9   :  { %s165_s17 = scalar_lea.hbm %s268_s4, 256 }
  0xfa   :  { %p166_p5 = scmp.ne.s32.totalorder %s268_s4, %s165_s17  ;;  %p169_p6 = scmp.lt.u32.totalorder %s165_s17, %s268_s4 }
  0xfc   :  { %p171_p7 = pnand %p169_p6, %p166_p5 }
  0xfe   :  { %174 = shalt.err (!%p171_p7)
}
  0xff   :  { %s180_s21 = smov 128   ;;  %s181_s22 = smov 8  }
 0x100   :  { %124 = dma.vmem_to_hbm [thread:$0]  %s119_s12, 256, %s268_s4, [#allocation4], %s180_s21, %s180_s21, %s181_s22  }
 0x101   :  { %175 = dma.done.wait [#allocation4], 256  }
 0x102   :  { %176 = vsyncadd [#allocation4], 4294967040 }
 0x103   :  { %128 = vsyncpa [#allocation4], 1 }

</bundles_post_ra>
